<compile_context>
chip_gen: v5e
topology: v5e:2x2
jax: 0.10.0
libtpu: 0.0.40
codegen_flags: <defaults>
</compile_context>

<pallas_src>
import functools
import math

import jax
import jax.numpy as jnp
from jax import lax
from jax.experimental import pallas as pl
from jax.experimental.pallas import tpu as pltpu


def _encoder_layer_kernel(
    x_ref,                                   # (1, S, D)  f32
    wqkv_ref, bqkv_ref,                      # (D, 3D) bf16, (1, 3D) f32
    wo_ref, bo_ref,                          # (D, D)  bf16, (1, D)  f32
    w1_ref, b1_ref,                          # (D, F)  bf16, (1, F)  f32
    w2_ref, b2_ref,                          # (F, D)  bf16, (1, D)  f32
    g1_ref, be1_ref, g2_ref, be2_ref,        # (1, D)  f32 each
    o_ref,                                   # (1, TM, D)
    k_scr, v_scr,                            # (NKV, H, KVT, hd) bf16 scratch
    *, num_heads: int, head_dim: int, q_tile: int, kv_tile: int,
    num_kv_tiles: int, approx_recip: bool,
):
    eps = 1e-5
    D = num_heads * head_dim
    S = x_ref.shape[1]

    # ---- K/V projection: once per batch element, cached across all q tiles ----
    @pl.when(pl.program_id(1) == 0)
    def _project_kv():
        x_bf = x_ref[0].astype(jnp.bfloat16)                       # (S, D)
        kv = jnp.dot(x_bf, wqkv_ref[:, D:],
                     preferred_element_type=jnp.float32) + bqkv_ref[:, D:]
        k = kv[:, :D].reshape(S, num_heads, head_dim).astype(jnp.bfloat16)
        v = kv[:, D:].reshape(S, num_heads, head_dim).astype(jnp.bfloat16)
        # One-time head-major relayout, amortized over all query tiles.
        for j in range(num_kv_tiles):
            sl = slice(j * kv_tile, (j + 1) * kv_tile)
            k_scr[j] = jnp.swapaxes(k[sl], 0, 1)                   # (H, KVT, hd)
            v_scr[j] = jnp.swapaxes(v[sl], 0, 1)

    # ---- Q projection for this query tile ----
    qi = pl.program_id(1)
    if q_tile == S:
        x_tile = x_ref[0]                                          # (TM, D) f32
    else:
        row0 = pl.multiple_of(qi * q_tile, q_tile)
        x_tile = x_ref[0, pl.ds(row0, q_tile), :]
    q = jnp.dot(x_tile.astype(jnp.bfloat16), wqkv_ref[:, :D],
                preferred_element_type=jnp.float32) + bqkv_ref[:, :D]
    # Fold softmax scale into Q once (O(TM*D) instead of O(H*TM*S)).
    q = q * (1.0 / math.sqrt(head_dim))
    q3 = jnp.swapaxes(q.reshape(q_tile, num_heads, head_dim), 0, 1
                      ).astype(jnp.bfloat16)                        # (H, TM, hd)

    def recip(t):
        return pl.reciprocal(t, approx=True) if approx_recip else 1.0 / t

    if num_kv_tiles == 1:
        # Small-S path: full scores, plain softmax.
        s = jnp.einsum("hqd,hkd->hqk", q3, k_scr[0],
                       preferred_element_type=jnp.float32)          # (H, TM, S)
        m = jnp.max(s, axis=-1, keepdims=True)
        p = jnp.exp(s - m)
        l = jnp.sum(p, axis=-1, keepdims=True)
        ctx = jnp.einsum("hqk,hkd->hqd", p.astype(jnp.bfloat16), v_scr[0],
                         preferred_element_type=jnp.float32)         # (H, TM, hd)
        ctx = ctx * recip(l)
    else:
        # Flash-style online softmax over KV tiles: bounds the live set to
        # O(H*TM*kv_tile) instead of O(H*TM*S).
        m0 = jnp.full((num_heads, q_tile, 1), -1e30, jnp.float32)
        l0 = jnp.zeros((num_heads, q_tile, 1), jnp.float32)
        a0 = jnp.zeros((num_heads, q_tile, head_dim), jnp.float32)

        def kv_step(j, carry):
            m_i, l_i, acc = carry
            k_blk = k_scr[j]                                        # (H, KVT, hd)
            v_blk = v_scr[j]
            s = jnp.einsum("hqd,hkd->hqk", q3, k_blk,
                           preferred_element_type=jnp.float32)       # (H, TM, KVT)
            m_new = jnp.maximum(m_i, jnp.max(s, axis=-1, keepdims=True))
            alpha = jnp.exp(m_i - m_new)
            p = jnp.exp(s - m_new)
            l_new = alpha * l_i + jnp.sum(p, axis=-1, keepdims=True)
            acc_new = alpha * acc + jnp.einsum(
                "hqk,hkd->hqd", p.astype(jnp.bfloat16), v_blk,
                preferred_element_type=jnp.float32)
            return m_new, l_new, acc_new

        _, l_f, acc_f = lax.fori_loop(0, num_kv_tiles, kv_step, (m0, l0, a0))
        ctx = acc_f * recip(l_f)

    ctx = jnp.swapaxes(ctx, 0, 1).reshape(q_tile, D)                 # (TM, D)

    attn = jnp.dot(ctx.astype(jnp.bfloat16), wo_ref[...],
                   preferred_element_type=jnp.float32) + bo_ref[...]

    # --- residual + LayerNorm 1 (two-pass variance); dropout = identity ---
    h1 = x_tile + attn
    mu1 = jnp.mean(h1, axis=-1, keepdims=True)
    d1 = h1 - mu1
    var1 = jnp.mean(d1 * d1, axis=-1, keepdims=True)
    h1 = d1 * lax.rsqrt(var1 + eps) * g1_ref[...] + be1_ref[...]

    # --- position-wise feed-forward ---
    f = jnp.dot(h1.astype(jnp.bfloat16), w1_ref[...],
                preferred_element_type=jnp.float32) + b1_ref[...]
    f = jnp.maximum(f, 0.0)
    f = jnp.dot(f.astype(jnp.bfloat16), w2_ref[...],
                preferred_element_type=jnp.float32) + b2_ref[...]

    # --- residual + LayerNorm 2 ---
    h2 = h1 + f
    mu2 = jnp.mean(h2, axis=-1, keepdims=True)
    d2 = h2 - mu2
    var2 = jnp.mean(d2 * d2, axis=-1, keepdims=True)
    out = d2 * lax.rsqrt(var2 + eps) * g2_ref[...] + be2_ref[...]

    o_ref[0] = out.astype(o_ref.dtype)


def encoder_layer_pallas(x, params, num_heads, *, q_tile=None, kv_tile=None,
                         approx_reciprocal=True, single_buffer_weights=True):
    B, S, D = x.shape
    F = params["w1"].shape[1]
    head_dim = D // num_heads
    assert head_dim * num_heads == D, "d_model must be divisible by num_heads"

    # Per-generation default query tile: v6e/v7x MXU is 2x256^2 -> prefer M=256;
    # v5e MXU is 4x128^2 -> M=128 is enough.
    if q_tile is None:
        try:
            kind = jax.devices()[0].device_kind.lower()
        except Exception:
            kind = ""
        preferred = 256 if ("v6" in kind or "v7" in kind) else 128
        if S <= preferred:
            q_tile = S
        else:
            q_tile = next((t for t in (preferred, 128, 64, 32, 16, 8)
                           if S % t == 0), S)
    assert S % q_tile == 0
    nq = S // q_tile

    if kv_tile is None:
        if S <= 512:
            kv_tile = S
        else:
            kv_tile = next((t for t in (512, 256, 128) if S % t == 0), S)
    assert S % kv_tile == 0
    nkv = S // kv_tile

    # MXU operands in bf16 (f32 accumulation); biases / LN params stay f32.
    wdt = jnp.bfloat16
    wqkv = jnp.concatenate(
        [params["wq"], params["wk"], params["wv"]], axis=1).astype(wdt)
    bqkv = jnp.concatenate(
        [params["bq"], params["bk"], params["bv"]]).reshape(1, 3 * D)

    args = (
        x,
        wqkv, bqkv,
        params["wo"].astype(wdt), params["bo"].reshape(1, D),
        params["w1"].astype(wdt), params["b1"].reshape(1, F),
        params["w2"].astype(wdt), params["b2"].reshape(1, D),
        params["g1"].reshape(1, D), params["be1"].reshape(1, D),
        params["g2"].reshape(1, D), params["be2"].reshape(1, D),
    )

    kernel = functools.partial(
        _encoder_layer_kernel,
        num_heads=num_heads, head_dim=head_dim,
        q_tile=q_tile, kv_tile=kv_tile, num_kv_tiles=nkv,
        approx_recip=approx_reciprocal,
    )

    nbytes = lambda a: int(a.size) * a.dtype.itemsize
    param_bytes = sum(nbytes(a) for a in args[1:])

    def build(use_single_buffer):
        pm = {}
        if use_single_buffer and hasattr(pl, "Buffered"):
            # Constant block index -> a second pipeline buffer is never used.
            pm = {"pipeline_mode": pl.Buffered(1)}

        def const2d(shape):
            return pl.BlockSpec(shape, lambda b, q: (0, 0), **pm)

        in_specs = [
            pl.BlockSpec((1, S, D), lambda b, q: (b, 0, 0)),   # x (full seq)
            const2d((D, 3 * D)), const2d((1, 3 * D)),          # fused Wqkv, bqkv
            const2d((D, D)), const2d((1, D)),                  # wo, bo
            const2d((D, F)), const2d((1, F)),                  # w1, b1
            const2d((F, D)), const2d((1, D)),                  # w2, b2
            const2d((1, D)), const2d((1, D)),                  # ln1 gamma/beta
            const2d((1, D)), const2d((1, D)),                  # ln2 gamma/beta
        ]

        # VMEM budget: weights (1x or 2x buffered) + 2x x-block + KV scratch +
        # per-step activations, capped against the physical per-core capacity.
        wbuf = 1 if pm else 2
        want = (wbuf * param_bytes
                + 2 * S * D * 4                        # x block, double buffered
                + 2 * S * D * 2                        # bf16 K/V scratch
                + S * 2 * D * 4                        # (S,2D) f32 kv intermediate
                + 4 * (num_heads * q_tile * kv_tile * 2
                       + 2 * q_tile * F
                       + 10 * q_tile * D)
                + 2 * q_tile * D * 4)                  # output, double buffered
        try:
            cap = int(0.85 * pltpu.get_tpu_info().vmem_capacity_bytes)
        except Exception:
            cap = 64 * 2**20
        vmem_limit = int(min(cap, max(32 * 2**20, 2 * want)))

        return pl.pallas_call(
            kernel,
            out_shape=jax.ShapeDtypeStruct((B, S, D), x.dtype),
            grid_spec=pltpu.PrefetchScalarGridSpec(
                num_scalar_prefetch=0,
                grid=(B, nq),
                in_specs=in_specs,
                out_specs=pl.BlockSpec((1, q_tile, D), lambda b, q: (b, q, 0)),
                scratch_shapes=[
                    pltpu.VMEM((nkv, num_heads, kv_tile, head_dim), jnp.bfloat16),
                    pltpu.VMEM((nkv, num_heads, kv_tile, head_dim), jnp.bfloat16),
                ]),
            compiler_params=pltpu.CompilerParams(
                # q axis must be "arbitrary": the KV scratch filled at q==0 is
                # reused by later q tiles of the same batch element.
                dimension_semantics=("parallel", "arbitrary"),
                vmem_limit_bytes=vmem_limit,
            ),
        )

    if single_buffer_weights:
        try:
            return build(True)(*args)
        except Exception:
            pass  # installed JAX rejected Buffered(1); fall back to default buffering
    return build(False)(*args)


def encoder_layer_reference(x, params, num_heads):
    """Pure-JAX f32 reference mirroring the PyTorch module (eval mode)."""
    B, S, D = x.shape
    hd = D // num_heads
    eps = 1e-5

    def linear(t, w, b):
        return t @ w + b

    def layer_norm(t, g, b):
        mu = jnp.mean(t, axis=-1, keepdims=True)
        var = jnp.mean((t - mu) ** 2, axis=-1, keepdims=True)
        return (t - mu) * lax.rsqrt(var + eps) * g + b

    q = linear(x, params["wq"], params["bq"])
    k = linear(x, params["wk"], params["bk"])
    v = linear(x, params["wv"], params["bv"])
    q = q.reshape(B, S, num_heads, hd).transpose(0, 2, 1, 3)
    k = k.reshape(B, S, num_heads, hd).transpose(0, 2, 1, 3)
    v = v.reshape(B, S, num_heads, hd).transpose(0, 2, 1, 3)
    scores = (q @ k.transpose(0, 1, 3, 2)) / math.sqrt(hd)
    attn = jax.nn.softmax(scores, axis=-1)
    out = (attn @ v).transpose(0, 2, 1, 3).reshape(B, S, D)
    out = linear(out, params["wo"], params["bo"])

    h1 = layer_norm(x + out, params["g1"], params["be1"])
    ff = linear(jnp.maximum(linear(h1, params["w1"], params["b1"]), 0.0),
                params["w2"], params["b2"])
    return layer_norm(h1 + ff, params["g2"], params["be2"])


def init_params(key, d_model, d_ff):
    ks = jax.random.split(key, 12)
    s = 0.05
    return {
        "wq": jax.random.normal(ks[0], (d_model, d_model), jnp.float32) * s,
        "bq": jax.random.normal(ks[1], (d_model,), jnp.float32) * s,
        "wk": jax.random.normal(ks[2], (d_model, d_model), jnp.float32) * s,
        "bk": jax.random.normal(ks[3], (d_model,), jnp.float32) * s,
        "wv": jax.random.normal(ks[4], (d_model, d_model), jnp.float32) * s,
        "bv": jax.random.normal(ks[5], (d_model,), jnp.float32) * s,
        "wo": jax.random.normal(ks[6], (d_model, d_model), jnp.float32) * s,
        "bo": jax.random.normal(ks[7], (d_model,), jnp.float32) * s,
        "w1": jax.random.normal(ks[8], (d_model, d_ff), jnp.float32) * s,
        "b1": jax.random.normal(ks[9], (d_ff,), jnp.float32) * s,
        "w2": jax.random.normal(ks[10], (d_ff, d_model), jnp.float32) * s,
        "b2": jax.random.normal(ks[11], (d_model,), jnp.float32) * s,
        # LayerNorm defaults (PyTorch): weight=1, bias=0
        "g1": jnp.ones((d_model,), jnp.float32),
        "be1": jnp.zeros((d_model,), jnp.float32),
        "g2": jnp.ones((d_model,), jnp.float32),
        "be2": jnp.zeros((d_model,), jnp.float32),
    }


def _run_case(B, S, D, H, FF, key, **kw):
    kx, kp = jax.random.split(key)
    x = jax.random.normal(kx, (B, S, D), jnp.float32)
    params = init_params(kp, D, FF)
    out = jax.block_until_ready(encoder_layer_pallas(x, params, num_heads=H, **kw))
    ref = encoder_layer_reference(x, params, num_heads=H)
    assert out.shape == (B, S, D)
    err = float(jnp.max(jnp.abs(out - ref)))
    # Tolerance loosened vs the pure-f32 reference: MXU operands are bf16 and
    # the softmax denominator uses the approximate EUP reciprocal.
    assert jnp.allclose(out, ref, atol=5e-2, rtol=5e-2), err
    return err


if __name__ == "__main__":
    key = jax.random.PRNGKey(0)
    k1, k2 = jax.random.split(key)

    # Small shapes consistent with the module (single-tile path).
    _run_case(2, 8, 32, 4, 64, k1)
    # Tiled path: exercises KV caching across q tiles + flash-style KV loop.
    _run_case(2, 256, 128, 4, 256, k2, q_tile=128, kv_tile=128)

    print("KERNEL_OK")
</pallas_src>

<mosaic_0001>
module attributes {stable_mosaic.version = 11 : i64} {
  func.func @_encoder_layer_kernel(%arg0: i32, %arg1: i32, %arg2: memref<1x8x32xf32, #tpu.memory_space<vmem>>, %arg3: memref<32x96xbf16, #tpu.memory_space<vmem>>, %arg4: memref<1x96xf32, #tpu.memory_space<vmem>>, %arg5: memref<32x32xbf16, #tpu.memory_space<vmem>>, %arg6: memref<1x32xf32, #tpu.memory_space<vmem>>, %arg7: memref<32x64xbf16, #tpu.memory_space<vmem>>, %arg8: memref<1x64xf32, #tpu.memory_space<vmem>>, %arg9: memref<64x32xbf16, #tpu.memory_space<vmem>>, %arg10: memref<1x32xf32, #tpu.memory_space<vmem>>, %arg11: memref<1x32xf32, #tpu.memory_space<vmem>>, %arg12: memref<1x32xf32, #tpu.memory_space<vmem>>, %arg13: memref<1x32xf32, #tpu.memory_space<vmem>>, %arg14: memref<1x32xf32, #tpu.memory_space<vmem>>, %arg15: memref<1x8x32xf32, #tpu.memory_space<vmem>>, %arg16: memref<1x4x8x8xbf16, #tpu.memory_space<vmem>>, %arg17: memref<1x4x8x8xbf16, #tpu.memory_space<vmem>>) attributes {dimension_semantics = [#tpu.dimension_semantics<parallel>, #tpu.dimension_semantics<arbitrary>], iteration_bounds = array<i64: 2, 1>, scalar_prefetch = 0 : i64, scratch_operands = 2 : i64, tpu.core_type = #tpu.core_type<tc>, window_params = [{transform_indices = @transform_0, window_bounds = array<i64: 1, 8, 32>}, {pipeline_mode = #tpu.pipeline_mode<synchronous>, transform_indices = @transform_1, window_bounds = array<i64: 32, 96>}, {pipeline_mode = #tpu.pipeline_mode<synchronous>, transform_indices = @transform_2, window_bounds = array<i64: 1, 96>}, {pipeline_mode = #tpu.pipeline_mode<synchronous>, transform_indices = @transform_3, window_bounds = array<i64: 32, 32>}, {pipeline_mode = #tpu.pipeline_mode<synchronous>, transform_indices = @transform_4, window_bounds = array<i64: 1, 32>}, {pipeline_mode = #tpu.pipeline_mode<synchronous>, transform_indices = @transform_5, window_bounds = array<i64: 32, 64>}, {pipeline_mode = #tpu.pipeline_mode<synchronous>, transform_indices = @transform_6, window_bounds = array<i64: 1, 64>}, {pipeline_mode = #tpu.pipeline_mode<synchronous>, transform_indices = @transform_7, window_bounds = array<i64: 64, 32>}, {pipeline_mode = #tpu.pipeline_mode<synchronous>, transform_indices = @transform_8, window_bounds = array<i64: 1, 32>}, {pipeline_mode = #tpu.pipeline_mode<synchronous>, transform_indices = @transform_9, window_bounds = array<i64: 1, 32>}, {pipeline_mode = #tpu.pipeline_mode<synchronous>, transform_indices = @transform_10, window_bounds = array<i64: 1, 32>}, {pipeline_mode = #tpu.pipeline_mode<synchronous>, transform_indices = @transform_11, window_bounds = array<i64: 1, 32>}, {pipeline_mode = #tpu.pipeline_mode<synchronous>, transform_indices = @transform_12, window_bounds = array<i64: 1, 32>}, {transform_indices = @transform_13, window_bounds = array<i64: 1, 8, 32>}]} {
    %c0_i32 = arith.constant 0 : i32
    %0 = arith.cmpi eq, %arg1, %c0_i32 : i32
    %1 = arith.extui %0 : i1 to i32
    %c0_i32_0 = arith.constant 0 : i32
    %2 = arith.cmpi ne, %1, %c0_i32_0 : i32
    scf.if %2 {
      %c0_57 = arith.constant 0 : index
      %c0_58 = arith.constant 0 : index
      %c0_59 = arith.constant 0 : index
      %104 = vector.load %arg2[%c0_57, %c0_58, %c0_59] : memref<1x8x32xf32, #tpu.memory_space<vmem>>, vector<1x8x32xf32>
      %105 = vector.shape_cast %104 : vector<1x8x32xf32> to vector<8x32xf32>
      %106 = arith.truncf %105 : vector<8x32xf32> to vector<8x32xbf16>
      %c0_60 = arith.constant 0 : index
      %c32 = arith.constant 32 : index
      %107 = vector.load %arg3[%c0_60, %c32] : memref<32x96xbf16, #tpu.memory_space<vmem>>, vector<32x64xbf16>
      %cst_61 = arith.constant dense<0.000000e+00> : vector<8x64xf32>
      %108 = tpu.matmul %106, %107, %cst_61 {dimension_numbers = #tpu.dot_dimension_numbers<[1], [0], [0], [1], [0, 0, 1, 1], [], []>} : vector<8x32xbf16>, vector<32x64xbf16>, vector<8x64xf32> -> vector<8x64xf32>
      %c0_62 = arith.constant 0 : index
      %c32_63 = arith.constant 32 : index
      %109 = vector.load %arg4[%c0_62, %c32_63] : memref<1x96xf32, #tpu.memory_space<vmem>>, vector<1x64xf32>
      %110 = vector.broadcast %109 : vector<1x64xf32> to vector<8x64xf32>
      %111 = arith.addf %108, %110 : vector<8x64xf32>
      %112 = vector.extract_strided_slice %111 {offsets = [0, 0], sizes = [8, 32], strides = [1, 1]} : vector<8x64xf32> to vector<8x32xf32>
      %113 = vector.shape_cast %112 : vector<8x32xf32> to vector<8x4x8xf32>
      %114 = arith.truncf %113 : vector<8x4x8xf32> to vector<8x4x8xbf16>
      %115 = vector.extract_strided_slice %111 {offsets = [0, 32], sizes = [8, 32], strides = [1, 1]} : vector<8x64xf32> to vector<8x32xf32>
      %116 = vector.shape_cast %115 : vector<8x32xf32> to vector<8x4x8xf32>
      %117 = arith.truncf %116 : vector<8x4x8xf32> to vector<8x4x8xbf16>
      %118 = tpu.transpose %114, [1, 0, 2] : vector<8x4x8xbf16> -> vector<4x8x8xbf16>
      %c0_64 = arith.constant 0 : index
      %c0_65 = arith.constant 0 : index
      %c0_66 = arith.constant 0 : index
      %c0_67 = arith.constant 0 : index
      %119 = vector.load %arg16[%c0_64, %c0_65, %c0_66, %c0_67] : memref<1x4x8x8xbf16, #tpu.memory_space<vmem>>, vector<1x4x8x8xbf16>
      %120 = vector.shape_cast %119 : vector<1x4x8x8xbf16> to vector<4x8x8xbf16>
      %121 = vector.shape_cast %118 : vector<4x8x8xbf16> to vector<1x4x8x8xbf16>
      tpu.vector_store %arg16[%c0_64, %c0_65, %c0_66, %c0_67], %121 {strides = array<i32>} : memref<1x4x8x8xbf16, #tpu.memory_space<vmem>>, vector<1x4x8x8xbf16>,
      %122 = tpu.transpose %117, [1, 0, 2] : vector<8x4x8xbf16> -> vector<4x8x8xbf16>
      %c0_68 = arith.constant 0 : index
      %c0_69 = arith.constant 0 : index
      %c0_70 = arith.constant 0 : index
      %c0_71 = arith.constant 0 : index
      %123 = vector.load %arg17[%c0_68, %c0_69, %c0_70, %c0_71] : memref<1x4x8x8xbf16, #tpu.memory_space<vmem>>, vector<1x4x8x8xbf16>
      %124 = vector.shape_cast %123 : vector<1x4x8x8xbf16> to vector<4x8x8xbf16>
      %125 = vector.shape_cast %122 : vector<4x8x8xbf16> to vector<1x4x8x8xbf16>
      tpu.vector_store %arg17[%c0_68, %c0_69, %c0_70, %c0_71], %125 {strides = array<i32>} : memref<1x4x8x8xbf16, #tpu.memory_space<vmem>>, vector<1x4x8x8xbf16>,
    } else {
    }
    %c0 = arith.constant 0 : index
    %c0_1 = arith.constant 0 : index
    %c0_2 = arith.constant 0 : index
    %3 = vector.load %arg2[%c0, %c0_1, %c0_2] : memref<1x8x32xf32, #tpu.memory_space<vmem>>, vector<1x8x32xf32>
    %4 = vector.shape_cast %3 : vector<1x8x32xf32> to vector<8x32xf32>
    %5 = arith.truncf %4 : vector<8x32xf32> to vector<8x32xbf16>
    %c0_3 = arith.constant 0 : index
    %c0_4 = arith.constant 0 : index
    %6 = vector.load %arg3[%c0_3, %c0_4] : memref<32x96xbf16, #tpu.memory_space<vmem>>, vector<32x32xbf16>
    %cst = arith.constant dense<0.000000e+00> : vector<8x32xf32>
    %7 = tpu.matmul %5, %6, %cst {dimension_numbers = #tpu.dot_dimension_numbers<[1], [0], [0], [1], [0, 0, 1, 1], [], []>} : vector<8x32xbf16>, vector<32x32xbf16>, vector<8x32xf32> -> vector<8x32xf32>
    %c0_5 = arith.constant 0 : index
    %c0_6 = arith.constant 0 : index
    %8 = vector.load %arg4[%c0_5, %c0_6] : memref<1x96xf32, #tpu.memory_space<vmem>>, vector<1x32xf32>
    %9 = vector.broadcast %8 : vector<1x32xf32> to vector<8x32xf32>
    %10 = arith.addf %7, %9 : vector<8x32xf32>
    %cst_7 = arith.constant 0.353553385 : f32
    %11 = vector.broadcast %cst_7 : f32 to vector<8x32xf32>
    %12 = arith.mulf %10, %11 : vector<8x32xf32>
    %13 = vector.shape_cast %12 : vector<8x32xf32> to vector<8x4x8xf32>
    %14 = tpu.transpose %13, [1, 0, 2] : vector<8x4x8xf32> -> vector<4x8x8xf32>
    %15 = arith.truncf %14 : vector<4x8x8xf32> to vector<4x8x8xbf16>
    %c0_8 = arith.constant 0 : index
    %c0_9 = arith.constant 0 : index
    %c0_10 = arith.constant 0 : index
    %c0_11 = arith.constant 0 : index
    %16 = vector.load %arg16[%c0_8, %c0_9, %c0_10, %c0_11] : memref<1x4x8x8xbf16, #tpu.memory_space<vmem>>, vector<1x4x8x8xbf16>
    %17 = vector.shape_cast %16 : vector<1x4x8x8xbf16> to vector<4x8x8xbf16>
    "tpu.trace_start"() <{level = 10 : i32, message = "hqd,hkd->hqk"}> : () -> ()
    %cst_12 = arith.constant dense<0.000000e+00> : vector<4x8x8xf32>
    %18 = tpu.matmul %15, %17, %cst_12 {dimension_numbers = #tpu.dot_dimension_numbers<[2], [2], [1], [1], [0, 0, 0, 1, 1, 1], [0], [0]>} : vector<4x8x8xbf16>, vector<4x8x8xbf16>, vector<4x8x8xf32> -> vector<4x8x8xf32>
    "tpu.trace_stop"() : () -> ()
    %cst_13 = arith.constant dense<0xFF800000> : vector<4x8xf32>
    %19 = vector.multi_reduction <maximumf>, %18, %cst_13 [2] : vector<4x8x8xf32> to vector<4x8xf32>
    %20 = vector.shape_cast %19 : vector<4x8xf32> to vector<4x8x1xf32>
    %21 = vector.broadcast %20 : vector<4x8x1xf32> to vector<4x8x8xf32>
    %22 = arith.subf %18, %21 : vector<4x8x8xf32>
    %23 = math.exp %22 : vector<4x8x8xf32>
    %cst_14 = arith.constant dense<0.000000e+00> : vector<4x8xf32>
    %24 = vector.multi_reduction <add>, %23, %cst_14 [2] : vector<4x8x8xf32> to vector<4x8xf32>
    %25 = vector.shape_cast %24 : vector<4x8xf32> to vector<4x8x1xf32>
    %26 = arith.truncf %23 : vector<4x8x8xf32> to vector<4x8x8xbf16>
    %c0_15 = arith.constant 0 : index
    %c0_16 = arith.constant 0 : index
    %c0_17 = arith.constant 0 : index
    %c0_18 = arith.constant 0 : index
    %27 = vector.load %arg17[%c0_15, %c0_16, %c0_17, %c0_18] : memref<1x4x8x8xbf16, #tpu.memory_space<vmem>>, vector<1x4x8x8xbf16>
    %28 = vector.shape_cast %27 : vector<1x4x8x8xbf16> to vector<4x8x8xbf16>
    "tpu.trace_start"() <{level = 10 : i32, message = "hqk,hkd->hqd"}> : () -> ()
    %cst_19 = arith.constant dense<0.000000e+00> : vector<4x8x8xf32>
    %29 = tpu.matmul %26, %28, %cst_19 {dimension_numbers = #tpu.dot_dimension_numbers<[2], [1], [1], [2], [0, 0, 0, 1, 1, 2], [0], [0]>} : vector<4x8x8xbf16>, vector<4x8x8xbf16>, vector<4x8x8xf32> -> vector<4x8x8xf32>
    "tpu.trace_stop"() : () -> ()
    %30 = tpu.reciprocal %25 {approx = true} : vector<4x8x1xf32> -> vector<4x8x1xf32>
    %31 = vector.broadcast %30 : vector<4x8x1xf32> to vector<4x8x8xf32>
    %32 = arith.mulf %29, %31 : vector<4x8x8xf32>
    %33 = tpu.transpose %32, [1, 0, 2] : vector<4x8x8xf32> -> vector<8x4x8xf32>
    %34 = vector.shape_cast %33 : vector<8x4x8xf32> to vector<8x32xf32>
    %35 = arith.truncf %34 : vector<8x32xf32> to vector<8x32xbf16>
    %c0_20 = arith.constant 0 : index
    %c0_21 = arith.constant 0 : index
    %36 = vector.load %arg5[%c0_20, %c0_21] : memref<32x32xbf16, #tpu.memory_space<vmem>>, vector<32x32xbf16>
    %cst_22 = arith.constant dense<0.000000e+00> : vector<8x32xf32>
    %37 = tpu.matmul %35, %36, %cst_22 {dimension_numbers = #tpu.dot_dimension_numbers<[1], [0], [0], [1], [0, 0, 1, 1], [], []>} : vector<8x32xbf16>, vector<32x32xbf16>, vector<8x32xf32> -> vector<8x32xf32>
    %c0_23 = arith.constant 0 : index
    %c0_24 = arith.constant 0 : index
    %38 = vector.load %arg6[%c0_23, %c0_24] : memref<1x32xf32, #tpu.memory_space<vmem>>, vector<1x32xf32>
    %39 = vector.broadcast %38 : vector<1x32xf32> to vector<8x32xf32>
    %40 = arith.addf %37, %39 : vector<8x32xf32>
    %41 = arith.addf %4, %40 : vector<8x32xf32>
    %cst_25 = arith.constant dense<0.000000e+00> : vector<8xf32>
    %42 = vector.multi_reduction <add>, %41, %cst_25 [1] : vector<8x32xf32> to vector<8xf32>
    %43 = vector.shape_cast %42 : vector<8xf32> to vector<8x1xf32>
    %cst_26 = arith.constant 3.200000e+01 : f32
    %44 = vector.broadcast %cst_26 : f32 to vector<8x1xf32>
    %45 = arith.divf %43, %44 : vector<8x1xf32>
    %46 = vector.broadcast %45 : vector<8x1xf32> to vector<8x32xf32>
    %47 = arith.subf %41, %46 : vector<8x32xf32>
    %48 = arith.mulf %47, %47 : vector<8x32xf32>
    %cst_27 = arith.constant dense<0.000000e+00> : vector<8xf32>
    %49 = vector.multi_reduction <add>, %48, %cst_27 [1] : vector<8x32xf32> to vector<8xf32>
    %50 = vector.shape_cast %49 : vector<8xf32> to vector<8x1xf32>
    %cst_28 = arith.constant 3.200000e+01 : f32
    %51 = vector.broadcast %cst_28 : f32 to vector<8x1xf32>
    %52 = arith.divf %50, %51 : vector<8x1xf32>
    %cst_29 = arith.constant 9.99999974E-6 : f32
    %53 = vector.broadcast %cst_29 : f32 to vector<8x1xf32>
    %54 = arith.addf %52, %53 : vector<8x1xf32>
    %55 = math.rsqrt %54 : vector<8x1xf32>
    %56 = vector.broadcast %55 : vector<8x1xf32> to vector<8x32xf32>
    %57 = arith.mulf %47, %56 : vector<8x32xf32>
    %c0_30 = arith.constant 0 : index
    %c0_31 = arith.constant 0 : index
    %58 = vector.load %arg11[%c0_30, %c0_31] : memref<1x32xf32, #tpu.memory_space<vmem>>, vector<1x32xf32>
    %59 = vector.broadcast %58 : vector<1x32xf32> to vector<8x32xf32>
    %60 = arith.mulf %57, %59 : vector<8x32xf32>
    %c0_32 = arith.constant 0 : index
    %c0_33 = arith.constant 0 : index
    %61 = vector.load %arg12[%c0_32, %c0_33] : memref<1x32xf32, #tpu.memory_space<vmem>>, vector<1x32xf32>
    %62 = vector.broadcast %61 : vector<1x32xf32> to vector<8x32xf32>
    %63 = arith.addf %60, %62 : vector<8x32xf32>
    %64 = arith.truncf %63 : vector<8x32xf32> to vector<8x32xbf16>
    %c0_34 = arith.constant 0 : index
    %c0_35 = arith.constant 0 : index
    %65 = vector.load %arg7[%c0_34, %c0_35] : memref<32x64xbf16, #tpu.memory_space<vmem>>, vector<32x64xbf16>
    %cst_36 = arith.constant dense<0.000000e+00> : vector<8x64xf32>
    %66 = tpu.matmul %64, %65, %cst_36 {dimension_numbers = #tpu.dot_dimension_numbers<[1], [0], [0], [1], [0, 0, 1, 1], [], []>} : vector<8x32xbf16>, vector<32x64xbf16>, vector<8x64xf32> -> vector<8x64xf32>
    %c0_37 = arith.constant 0 : index
    %c0_38 = arith.constant 0 : index
    %67 = vector.load %arg8[%c0_37, %c0_38] : memref<1x64xf32, #tpu.memory_space<vmem>>, vector<1x64xf32>
    %68 = vector.broadcast %67 : vector<1x64xf32> to vector<8x64xf32>
    %69 = arith.addf %66, %68 : vector<8x64xf32>
    %cst_39 = arith.constant 0.000000e+00 : f32
    %70 = vector.broadcast %cst_39 : f32 to vector<8x64xf32>
    %71 = arith.maximumf %69, %70 : vector<8x64xf32>
    %72 = arith.truncf %71 : vector<8x64xf32> to vector<8x64xbf16>
    %c0_40 = arith.constant 0 : index
    %c0_41 = arith.constant 0 : index
    %73 = vector.load %arg9[%c0_40, %c0_41] : memref<64x32xbf16, #tpu.memory_space<vmem>>, vector<64x32xbf16>
    %cst_42 = arith.constant dense<0.000000e+00> : vector<8x32xf32>
    %74 = tpu.matmul %72, %73, %cst_42 {dimension_numbers = #tpu.dot_dimension_numbers<[1], [0], [0], [1], [0, 0, 1, 1], [], []>} : vector<8x64xbf16>, vector<64x32xbf16>, vector<8x32xf32> -> vector<8x32xf32>
    %c0_43 = arith.constant 0 : index
    %c0_44 = arith.constant 0 : index
    %75 = vector.load %arg10[%c0_43, %c0_44] : memref<1x32xf32, #tpu.memory_space<vmem>>, vector<1x32xf32>
    %76 = vector.broadcast %75 : vector<1x32xf32> to vector<8x32xf32>
    %77 = arith.addf %74, %76 : vector<8x32xf32>
    %78 = arith.addf %63, %77 : vector<8x32xf32>
    %cst_45 = arith.constant dense<0.000000e+00> : vector<8xf32>
    %79 = vector.multi_reduction <add>, %78, %cst_45 [1] : vector<8x32xf32> to vector<8xf32>
    %80 = vector.shape_cast %79 : vector<8xf32> to vector<8x1xf32>
    %cst_46 = arith.constant 3.200000e+01 : f32
    %81 = vector.broadcast %cst_46 : f32 to vector<8x1xf32>
    %82 = arith.divf %80, %81 : vector<8x1xf32>
    %83 = vector.broadcast %82 : vector<8x1xf32> to vector<8x32xf32>
    %84 = arith.subf %78, %83 : vector<8x32xf32>
    %85 = arith.mulf %84, %84 : vector<8x32xf32>
    %cst_47 = arith.constant dense<0.000000e+00> : vector<8xf32>
    %86 = vector.multi_reduction <add>, %85, %cst_47 [1] : vector<8x32xf32> to vector<8xf32>
    %87 = vector.shape_cast %86 : vector<8xf32> to vector<8x1xf32>
    %cst_48 = arith.constant 3.200000e+01 : f32
    %88 = vector.broadcast %cst_48 : f32 to vector<8x1xf32>
    %89 = arith.divf %87, %88 : vector<8x1xf32>
    %cst_49 = arith.constant 9.99999974E-6 : f32
    %90 = vector.broadcast %cst_49 : f32 to vector<8x1xf32>
    %91 = arith.addf %89, %90 : vector<8x1xf32>
    %92 = math.rsqrt %91 : vector<8x1xf32>
    %93 = vector.broadcast %92 : vector<8x1xf32> to vector<8x32xf32>
    %94 = arith.mulf %84, %93 : vector<8x32xf32>
    %c0_50 = arith.constant 0 : index
    %c0_51 = arith.constant 0 : index
    %95 = vector.load %arg13[%c0_50, %c0_51] : memref<1x32xf32, #tpu.memory_space<vmem>>, vector<1x32xf32>
    %96 = vector.broadcast %95 : vector<1x32xf32> to vector<8x32xf32>
    %97 = arith.mulf %94, %96 : vector<8x32xf32>
    %c0_52 = arith.constant 0 : index
    %c0_53 = arith.constant 0 : index
    %98 = vector.load %arg14[%c0_52, %c0_53] : memref<1x32xf32, #tpu.memory_space<vmem>>, vector<1x32xf32>
    %99 = vector.broadcast %98 : vector<1x32xf32> to vector<8x32xf32>
    %100 = arith.addf %97, %99 : vector<8x32xf32>
    %c0_54 = arith.constant 0 : index
    %c0_55 = arith.constant 0 : index
    %c0_56 = arith.constant 0 : index
    %101 = vector.load %arg15[%c0_54, %c0_55, %c0_56] : memref<1x8x32xf32, #tpu.memory_space<vmem>>, vector<1x8x32xf32>
    %102 = vector.shape_cast %101 : vector<1x8x32xf32> to vector<8x32xf32>
    %103 = vector.shape_cast %100 : vector<8x32xf32> to vector<1x8x32xf32>
    tpu.vector_store %arg15[%c0_54, %c0_55, %c0_56], %103 {strides = array<i32>} : memref<1x8x32xf32, #tpu.memory_space<vmem>>, vector<1x8x32xf32>,
    return
  }
  func.func @transform_0(%arg0: i32, %arg1: i32) -> (i32, i32, i32) {
    %c0_i32 = arith.constant 0 : i32
    %c0_i32_0 = arith.constant 0 : i32
    %c0_i32_1 = arith.constant 0 : i32
    return %arg0, %c0_i32, %c0_i32_0 : i32, i32, i32
  }
  func.func @transform_1(%arg0: i32, %arg1: i32) -> (i32, i32) {
    %c0_i32 = arith.constant 0 : i32
    %c0_i32_0 = arith.constant 0 : i32
    %c0_i32_1 = arith.constant 0 : i32
    return %c0_i32, %c0_i32_0 : i32, i32
  }
  func.func @transform_2(%arg0: i32, %arg1: i32) -> (i32, i32) {
    %c0_i32 = arith.constant 0 : i32
    %c0_i32_0 = arith.constant 0 : i32
    %c0_i32_1 = arith.constant 0 : i32
    return %c0_i32, %c0_i32_0 : i32, i32
  }
  func.func @transform_3(%arg0: i32, %arg1: i32) -> (i32, i32) {
    %c0_i32 = arith.constant 0 : i32
    %c0_i32_0 = arith.constant 0 : i32
    %c0_i32_1 = arith.constant 0 : i32
    return %c0_i32, %c0_i32_0 : i32, i32
  }
  func.func @transform_4(%arg0: i32, %arg1: i32) -> (i32, i32) {
    %c0_i32 = arith.constant 0 : i32
    %c0_i32_0 = arith.constant 0 : i32
    %c0_i32_1 = arith.constant 0 : i32
    return %c0_i32, %c0_i32_0 : i32, i32
  }
  func.func @transform_5(%arg0: i32, %arg1: i32) -> (i32, i32) {
    %c0_i32 = arith.constant 0 : i32
    %c0_i32_0 = arith.constant 0 : i32
    %c0_i32_1 = arith.constant 0 : i32
    return %c0_i32, %c0_i32_0 : i32, i32
  }
  func.func @transform_6(%arg0: i32, %arg1: i32) -> (i32, i32) {
    %c0_i32 = arith.constant 0 : i32
    %c0_i32_0 = arith.constant 0 : i32
    %c0_i32_1 = arith.constant 0 : i32
    return %c0_i32, %c0_i32_0 : i32, i32
  }
  func.func @transform_7(%arg0: i32, %arg1: i32) -> (i32, i32) {
    %c0_i32 = arith.constant 0 : i32
    %c0_i32_0 = arith.constant 0 : i32
    %c0_i32_1 = arith.constant 0 : i32
    return %c0_i32, %c0_i32_0 : i32, i32
  }
  func.func @transform_8(%arg0: i32, %arg1: i32) -> (i32, i32) {
    %c0_i32 = arith.constant 0 : i32
    %c0_i32_0 = arith.constant 0 : i32
    %c0_i32_1 = arith.constant 0 : i32
    return %c0_i32, %c0_i32_0 : i32, i32
  }
  func.func @transform_9(%arg0: i32, %arg1: i32) -> (i32, i32) {
    %c0_i32 = arith.constant 0 : i32
    %c0_i32_0 = arith.constant 0 : i32
    %c0_i32_1 = arith.constant 0 : i32
    return %c0_i32, %c0_i32_0 : i32, i32
  }
  func.func @transform_10(%arg0: i32, %arg1: i32) -> (i32, i32) {
    %c0_i32 = arith.constant 0 : i32
    %c0_i32_0 = arith.constant 0 : i32
    %c0_i32_1 = arith.constant 0 : i32
    return %c0_i32, %c0_i32_0 : i32, i32
  }
  func.func @transform_11(%arg0: i32, %arg1: i32) -> (i32, i32) {
    %c0_i32 = arith.constant 0 : i32
    %c0_i32_0 = arith.constant 0 : i32
    %c0_i32_1 = arith.constant 0 : i32
    return %c0_i32, %c0_i32_0 : i32, i32
  }
  func.func @transform_12(%arg0: i32, %arg1: i32) -> (i32, i32) {
    %c0_i32 = arith.constant 0 : i32
    %c0_i32_0 = arith.constant 0 : i32
    %c0_i32_1 = arith.constant 0 : i32
    return %c0_i32, %c0_i32_0 : i32, i32
  }
  func.func @transform_13(%arg0: i32, %arg1: i32) -> (i32, i32, i32) {
    %c0_i32 = arith.constant 0 : i32
    %c0_i32_0 = arith.constant 0 : i32
    return %arg0, %arg1, %c0_i32 : i32, i32, i32
  }
}

module attributes {stable_mosaic.version = 11 : i64} {
  func.func @_encoder_layer_kernel(%arg0: i32, %arg1: i32, %arg2: memref<1x8x32xf32, #tpu.memory_space<vmem>>, %arg3: memref<32x96xbf16, #tpu.memory_space<vmem>>, %arg4: memref<1x96xf32, #tpu.memory_space<vmem>>, %arg5: memref<32x32xbf16, #tpu.memory_space<vmem>>, %arg6: memref<1x32xf32, #tpu.memory_space<vmem>>, %arg7: memref<32x64xbf16, #tpu.memory_space<vmem>>, %arg8: memref<1x64xf32, #tpu.memory_space<vmem>>, %arg9: memref<64x32xbf16, #tpu.memory_space<vmem>>, %arg10: memref<1x32xf32, #tpu.memory_space<vmem>>, %arg11: memref<1x32xf32, #tpu.memory_space<vmem>>, %arg12: memref<1x32xf32, #tpu.memory_space<vmem>>, %arg13: memref<1x32xf32, #tpu.memory_space<vmem>>, %arg14: memref<1x32xf32, #tpu.memory_space<vmem>>, %arg15: memref<1x8x32xf32, #tpu.memory_space<vmem>>, %arg16: memref<1x4x8x8xbf16, #tpu.memory_space<vmem>>, %arg17: memref<1x4x8x8xbf16, #tpu.memory_space<vmem>>) attributes {dimension_semantics = [#tpu.dimension_semantics<parallel>, #tpu.dimension_semantics<arbitrary>], iteration_bounds = array<i64: 2, 1>, scalar_prefetch = 0 : i64, scratch_operands = 2 : i64, tpu.core_type = #tpu.core_type<tc>, window_params = [{transform_indices = @transform_0, window_bounds = array<i64: 1, 8, 32>}, {pipeline_mode = #tpu.pipeline_mode<synchronous>, transform_indices = @transform_1, window_bounds = array<i64: 32, 96>}, {pipeline_mode = #tpu.pipeline_mode<synchronous>, transform_indices = @transform_2, window_bounds = array<i64: 1, 96>}, {pipeline_mode = #tpu.pipeline_mode<synchronous>, transform_indices = @transform_3, window_bounds = array<i64: 32, 32>}, {pipeline_mode = #tpu.pipeline_mode<synchronous>, transform_indices = @transform_4, window_bounds = array<i64: 1, 32>}, {pipeline_mode = #tpu.pipeline_mode<synchronous>, transform_indices = @transform_5, window_bounds = array<i64: 32, 64>}, {pipeline_mode = #tpu.pipeline_mode<synchronous>, transform_indices = @transform_6, window_bounds = array<i64: 1, 64>}, {pipeline_mode = #tpu.pipeline_mode<synchronous>, transform_indices = @transform_7, window_bounds = array<i64: 64, 32>}, {pipeline_mode = #tpu.pipeline_mode<synchronous>, transform_indices = @transform_8, window_bounds = array<i64: 1, 32>}, {pipeline_mode = #tpu.pipeline_mode<synchronous>, transform_indices = @transform_9, window_bounds = array<i64: 1, 32>}, {pipeline_mode = #tpu.pipeline_mode<synchronous>, transform_indices = @transform_10, window_bounds = array<i64: 1, 32>}, {pipeline_mode = #tpu.pipeline_mode<synchronous>, transform_indices = @transform_11, window_bounds = array<i64: 1, 32>}, {pipeline_mode = #tpu.pipeline_mode<synchronous>, transform_indices = @transform_12, window_bounds = array<i64: 1, 32>}, {transform_indices = @transform_13, window_bounds = array<i64: 1, 8, 32>}]} {
    %c0_i32 = arith.constant 0 : i32
    %0 = arith.cmpi eq, %arg1, %c0_i32 : i32
    %1 = arith.extui %0 : i1 to i32
    %c0_i32_0 = arith.constant 0 : i32
    %2 = arith.cmpi ne, %1, %c0_i32_0 : i32
    scf.if %2 {
      %c0_57 = arith.constant 0 : index
      %c0_58 = arith.constant 0 : index
      %c0_59 = arith.constant 0 : index
      %104 = vector.load %arg2[%c0_57, %c0_58, %c0_59] : memref<1x8x32xf32, #tpu.memory_space<vmem>>, vector<1x8x32xf32>
      %105 = vector.shape_cast %104 : vector<1x8x32xf32> to vector<8x32xf32>
      %106 = arith.truncf %105 : vector<8x32xf32> to vector<8x32xbf16>
      %c0_60 = arith.constant 0 : index
      %c32 = arith.constant 32 : index
      %107 = vector.load %arg3[%c0_60, %c32] : memref<32x96xbf16, #tpu.memory_space<vmem>>, vector<32x64xbf16>
      %cst_61 = arith.constant dense<0.000000e+00> : vector<8x64xf32>
      %108 = tpu.matmul %106, %107, %cst_61 {dimension_numbers = #tpu.dot_dimension_numbers<[1], [0], [0], [1], [0, 0, 1, 1], [], []>} : vector<8x32xbf16>, vector<32x64xbf16>, vector<8x64xf32> -> vector<8x64xf32>
      %c0_62 = arith.constant 0 : index
      %c32_63 = arith.constant 32 : index
      %109 = vector.load %arg4[%c0_62, %c32_63] : memref<1x96xf32, #tpu.memory_space<vmem>>, vector<1x64xf32>
      %110 = vector.broadcast %109 : vector<1x64xf32> to vector<8x64xf32>
      %111 = arith.addf %108, %110 : vector<8x64xf32>
      %112 = vector.extract_strided_slice %111 {offsets = [0, 0], sizes = [8, 32], strides = [1, 1]} : vector<8x64xf32> to vector<8x32xf32>
      %113 = vector.shape_cast %112 : vector<8x32xf32> to vector<8x4x8xf32>
      %114 = arith.truncf %113 : vector<8x4x8xf32> to vector<8x4x8xbf16>
      %115 = vector.extract_strided_slice %111 {offsets = [0, 32], sizes = [8, 32], strides = [1, 1]} : vector<8x64xf32> to vector<8x32xf32>
      %116 = vector.shape_cast %115 : vector<8x32xf32> to vector<8x4x8xf32>
      %117 = arith.truncf %116 : vector<8x4x8xf32> to vector<8x4x8xbf16>
      %118 = tpu.transpose %114, [1, 0, 2] : vector<8x4x8xbf16> -> vector<4x8x8xbf16>
      %c0_64 = arith.constant 0 : index
      %c0_65 = arith.constant 0 : index
      %c0_66 = arith.constant 0 : index
      %c0_67 = arith.constant 0 : index
      %119 = vector.load %arg16[%c0_64, %c0_65, %c0_66, %c0_67] : memref<1x4x8x8xbf16, #tpu.memory_space<vmem>>, vector<1x4x8x8xbf16>
      %120 = vector.shape_cast %119 : vector<1x4x8x8xbf16> to vector<4x8x8xbf16>
      %121 = vector.shape_cast %118 : vector<4x8x8xbf16> to vector<1x4x8x8xbf16>
      tpu.vector_store %arg16[%c0_64, %c0_65, %c0_66, %c0_67], %121 {strides = array<i32>} : memref<1x4x8x8xbf16, #tpu.memory_space<vmem>>, vector<1x4x8x8xbf16>,
      %122 = tpu.transpose %117, [1, 0, 2] : vector<8x4x8xbf16> -> vector<4x8x8xbf16>
      %c0_68 = arith.constant 0 : index
      %c0_69 = arith.constant 0 : index
      %c0_70 = arith.constant 0 : index
      %c0_71 = arith.constant 0 : index
      %123 = vector.load %arg17[%c0_68, %c0_69, %c0_70, %c0_71] : memref<1x4x8x8xbf16, #tpu.memory_space<vmem>>, vector<1x4x8x8xbf16>
      %124 = vector.shape_cast %123 : vector<1x4x8x8xbf16> to vector<4x8x8xbf16>
      %125 = vector.shape_cast %122 : vector<4x8x8xbf16> to vector<1x4x8x8xbf16>
      tpu.vector_store %arg17[%c0_68, %c0_69, %c0_70, %c0_71], %125 {strides = array<i32>} : memref<1x4x8x8xbf16, #tpu.memory_space<vmem>>, vector<1x4x8x8xbf16>,
    } else {
    }
    %c0 = arith.constant 0 : index
    %c0_1 = arith.constant 0 : index
    %c0_2 = arith.constant 0 : index
    %3 = vector.load %arg2[%c0, %c0_1, %c0_2] : memref<1x8x32xf32, #tpu.memory_space<vmem>>, vector<1x8x32xf32>
    %4 = vector.shape_cast %3 : vector<1x8x32xf32> to vector<8x32xf32>
    %5 = arith.truncf %4 : vector<8x32xf32> to vector<8x32xbf16>
    %c0_3 = arith.constant 0 : index
    %c0_4 = arith.constant 0 : index
    %6 = vector.load %arg3[%c0_3, %c0_4] : memref<32x96xbf16, #tpu.memory_space<vmem>>, vector<32x32xbf16>
    %cst = arith.constant dense<0.000000e+00> : vector<8x32xf32>
    %7 = tpu.matmul %5, %6, %cst {dimension_numbers = #tpu.dot_dimension_numbers<[1], [0], [0], [1], [0, 0, 1, 1], [], []>} : vector<8x32xbf16>, vector<32x32xbf16>, vector<8x32xf32> -> vector<8x32xf32>
    %c0_5 = arith.constant 0 : index
    %c0_6 = arith.constant 0 : index
    %8 = vector.load %arg4[%c0_5, %c0_6] : memref<1x96xf32, #tpu.memory_space<vmem>>, vector<1x32xf32>
    %9 = vector.broadcast %8 : vector<1x32xf32> to vector<8x32xf32>
    %10 = arith.addf %7, %9 : vector<8x32xf32>
    %cst_7 = arith.constant 0.353553385 : f32
    %11 = vector.broadcast %cst_7 : f32 to vector<8x32xf32>
    %12 = arith.mulf %10, %11 : vector<8x32xf32>
    %13 = vector.shape_cast %12 : vector<8x32xf32> to vector<8x4x8xf32>
    %14 = tpu.transpose %13, [1, 0, 2] : vector<8x4x8xf32> -> vector<4x8x8xf32>
    %15 = arith.truncf %14 : vector<4x8x8xf32> to vector<4x8x8xbf16>
    %c0_8 = arith.constant 0 : index
    %c0_9 = arith.constant 0 : index
    %c0_10 = arith.constant 0 : index
    %c0_11 = arith.constant 0 : index
    %16 = vector.load %arg16[%c0_8, %c0_9, %c0_10, %c0_11] : memref<1x4x8x8xbf16, #tpu.memory_space<vmem>>, vector<1x4x8x8xbf16>
    %17 = vector.shape_cast %16 : vector<1x4x8x8xbf16> to vector<4x8x8xbf16>
    "tpu.trace_start"() <{level = 10 : i32, message = "hqd,hkd->hqk"}> : () -> ()
    %cst_12 = arith.constant dense<0.000000e+00> : vector<4x8x8xf32>
    %18 = tpu.matmul %15, %17, %cst_12 {dimension_numbers = #tpu.dot_dimension_numbers<[2], [2], [1], [1], [0, 0, 0, 1, 1, 1], [0], [0]>} : vector<4x8x8xbf16>, vector<4x8x8xbf16>, vector<4x8x8xf32> -> vector<4x8x8xf32>
    "tpu.trace_stop"() : () -> ()
    %cst_13 = arith.constant dense<0xFF800000> : vector<4x8xf32>
    %19 = vector.multi_reduction <maximumf>, %18, %cst_13 [2] : vector<4x8x8xf32> to vector<4x8xf32>
    %20 = vector.shape_cast %19 : vector<4x8xf32> to vector<4x8x1xf32>
    %21 = vector.broadcast %20 : vector<4x8x1xf32> to vector<4x8x8xf32>
    %22 = arith.subf %18, %21 : vector<4x8x8xf32>
    %23 = math.exp %22 : vector<4x8x8xf32>
    %cst_14 = arith.constant dense<0.000000e+00> : vector<4x8xf32>
    %24 = vector.multi_reduction <add>, %23, %cst_14 [2] : vector<4x8x8xf32> to vector<4x8xf32>
    %25 = vector.shape_cast %24 : vector<4x8xf32> to vector<4x8x1xf32>
    %26 = arith.truncf %23 : vector<4x8x8xf32> to vector<4x8x8xbf16>
    %c0_15 = arith.constant 0 : index
    %c0_16 = arith.constant 0 : index
    %c0_17 = arith.constant 0 : index
    %c0_18 = arith.constant 0 : index
    %27 = vector.load %arg17[%c0_15, %c0_16, %c0_17, %c0_18] : memref<1x4x8x8xbf16, #tpu.memory_space<vmem>>, vector<1x4x8x8xbf16>
    %28 = vector.shape_cast %27 : vector<1x4x8x8xbf16> to vector<4x8x8xbf16>
    "tpu.trace_start"() <{level = 10 : i32, message = "hqk,hkd->hqd"}> : () -> ()
    %cst_19 = arith.constant dense<0.000000e+00> : vector<4x8x8xf32>
    %29 = tpu.matmul %26, %28, %cst_19 {dimension_numbers = #tpu.dot_dimension_numbers<[2], [1], [1], [2], [0, 0, 0, 1, 1, 2], [0], [0]>} : vector<4x8x8xbf16>, vector<4x8x8xbf16>, vector<4x8x8xf32> -> vector<4x8x8xf32>
    "tpu.trace_stop"() : () -> ()
    %30 = tpu.reciprocal %25 {approx = true} : vector<4x8x1xf32> -> vector<4x8x1xf32>
    %31 = vector.broadcast %30 : vector<4x8x1xf32> to vector<4x8x8xf32>
    %32 = arith.mulf %29, %31 : vector<4x8x8xf32>
    %33 = tpu.transpose %32, [1, 0, 2] : vector<4x8x8xf32> -> vector<8x4x8xf32>
    %34 = vector.shape_cast %33 : vector<8x4x8xf32> to vector<8x32xf32>
    %35 = arith.truncf %34 : vector<8x32xf32> to vector<8x32xbf16>
    %c0_20 = arith.constant 0 : index
    %c0_21 = arith.constant 0 : index
    %36 = vector.load %arg5[%c0_20, %c0_21] : memref<32x32xbf16, #tpu.memory_space<vmem>>, vector<32x32xbf16>
    %cst_22 = arith.constant dense<0.000000e+00> : vector<8x32xf32>
    %37 = tpu.matmul %35, %36, %cst_22 {dimension_numbers = #tpu.dot_dimension_numbers<[1], [0], [0], [1], [0, 0, 1, 1], [], []>} : vector<8x32xbf16>, vector<32x32xbf16>, vector<8x32xf32> -> vector<8x32xf32>
    %c0_23 = arith.constant 0 : index
    %c0_24 = arith.constant 0 : index
    %38 = vector.load %arg6[%c0_23, %c0_24] : memref<1x32xf32, #tpu.memory_space<vmem>>, vector<1x32xf32>
    %39 = vector.broadcast %38 : vector<1x32xf32> to vector<8x32xf32>
    %40 = arith.addf %37, %39 : vector<8x32xf32>
    %41 = arith.addf %4, %40 : vector<8x32xf32>
    %cst_25 = arith.constant dense<0.000000e+00> : vector<8xf32>
    %42 = vector.multi_reduction <add>, %41, %cst_25 [1] : vector<8x32xf32> to vector<8xf32>
    %43 = vector.shape_cast %42 : vector<8xf32> to vector<8x1xf32>
    %cst_26 = arith.constant 3.200000e+01 : f32
    %44 = vector.broadcast %cst_26 : f32 to vector<8x1xf32>
    %45 = arith.divf %43, %44 : vector<8x1xf32>
    %46 = vector.broadcast %45 : vector<8x1xf32> to vector<8x32xf32>
    %47 = arith.subf %41, %46 : vector<8x32xf32>
    %48 = arith.mulf %47, %47 : vector<8x32xf32>
    %cst_27 = arith.constant dense<0.000000e+00> : vector<8xf32>
    %49 = vector.multi_reduction <add>, %48, %cst_27 [1] : vector<8x32xf32> to vector<8xf32>
    %50 = vector.shape_cast %49 : vector<8xf32> to vector<8x1xf32>
    %cst_28 = arith.constant 3.200000e+01 : f32
    %51 = vector.broadcast %cst_28 : f32 to vector<8x1xf32>
    %52 = arith.divf %50, %51 : vector<8x1xf32>
    %cst_29 = arith.constant 9.99999974E-6 : f32
    %53 = vector.broadcast %cst_29 : f32 to vector<8x1xf32>
    %54 = arith.addf %52, %53 : vector<8x1xf32>
    %55 = math.rsqrt %54 : vector<8x1xf32>
    %56 = vector.broadcast %55 : vector<8x1xf32> to vector<8x32xf32>
    %57 = arith.mulf %47, %56 : vector<8x32xf32>
    %c0_30 = arith.constant 0 : index
    %c0_31 = arith.constant 0 : index
    %58 = vector.load %arg11[%c0_30, %c0_31] : memref<1x32xf32, #tpu.memory_space<vmem>>, vector<1x32xf32>
    %59 = vector.broadcast %58 : vector<1x32xf32> to vector<8x32xf32>
    %60 = arith.mulf %57, %59 : vector<8x32xf32>
    %c0_32 = arith.constant 0 : index
    %c0_33 = arith.constant 0 : index
    %61 = vector.load %arg12[%c0_32, %c0_33] : memref<1x32xf32, #tpu.memory_space<vmem>>, vector<1x32xf32>
    %62 = vector.broadcast %61 : vector<1x32xf32> to vector<8x32xf32>
    %63 = arith.addf %60, %62 : vector<8x32xf32>
    %64 = arith.truncf %63 : vector<8x32xf32> to vector<8x32xbf16>
    %c0_34 = arith.constant 0 : index
    %c0_35 = arith.constant 0 : index
    %65 = vector.load %arg7[%c0_34, %c0_35] : memref<32x64xbf16, #tpu.memory_space<vmem>>, vector<32x64xbf16>
    %cst_36 = arith.constant dense<0.000000e+00> : vector<8x64xf32>
    %66 = tpu.matmul %64, %65, %cst_36 {dimension_numbers = #tpu.dot_dimension_numbers<[1], [0], [0], [1], [0, 0, 1, 1], [], []>} : vector<8x32xbf16>, vector<32x64xbf16>, vector<8x64xf32> -> vector<8x64xf32>
    %c0_37 = arith.constant 0 : index
    %c0_38 = arith.constant 0 : index
    %67 = vector.load %arg8[%c0_37, %c0_38] : memref<1x64xf32, #tpu.memory_space<vmem>>, vector<1x64xf32>
    %68 = vector.broadcast %67 : vector<1x64xf32> to vector<8x64xf32>
    %69 = arith.addf %66, %68 : vector<8x64xf32>
    %cst_39 = arith.constant 0.000000e+00 : f32
    %70 = vector.broadcast %cst_39 : f32 to vector<8x64xf32>
    %71 = arith.maximumf %69, %70 : vector<8x64xf32>
    %72 = arith.truncf %71 : vector<8x64xf32> to vector<8x64xbf16>
    %c0_40 = arith.constant 0 : index
    %c0_41 = arith.constant 0 : index
    %73 = vector.load %arg9[%c0_40, %c0_41] : memref<64x32xbf16, #tpu.memory_space<vmem>>, vector<64x32xbf16>
    %cst_42 = arith.constant dense<0.000000e+00> : vector<8x32xf32>
    %74 = tpu.matmul %72, %73, %cst_42 {dimension_numbers = #tpu.dot_dimension_numbers<[1], [0], [0], [1], [0, 0, 1, 1], [], []>} : vector<8x64xbf16>, vector<64x32xbf16>, vector<8x32xf32> -> vector<8x32xf32>
    %c0_43 = arith.constant 0 : index
    %c0_44 = arith.constant 0 : index
    %75 = vector.load %arg10[%c0_43, %c0_44] : memref<1x32xf32, #tpu.memory_space<vmem>>, vector<1x32xf32>
    %76 = vector.broadcast %75 : vector<1x32xf32> to vector<8x32xf32>
    %77 = arith.addf %74, %76 : vector<8x32xf32>
    %78 = arith.addf %63, %77 : vector<8x32xf32>
    %cst_45 = arith.constant dense<0.000000e+00> : vector<8xf32>
    %79 = vector.multi_reduction <add>, %78, %cst_45 [1] : vector<8x32xf32> to vector<8xf32>
    %80 = vector.shape_cast %79 : vector<8xf32> to vector<8x1xf32>
    %cst_46 = arith.constant 3.200000e+01 : f32
    %81 = vector.broadcast %cst_46 : f32 to vector<8x1xf32>
    %82 = arith.divf %80, %81 : vector<8x1xf32>
    %83 = vector.broadcast %82 : vector<8x1xf32> to vector<8x32xf32>
    %84 = arith.subf %78, %83 : vector<8x32xf32>
    %85 = arith.mulf %84, %84 : vector<8x32xf32>
    %cst_47 = arith.constant dense<0.000000e+00> : vector<8xf32>
    %86 = vector.multi_reduction <add>, %85, %cst_47 [1] : vector<8x32xf32> to vector<8xf32>
    %87 = vector.shape_cast %86 : vector<8xf32> to vector<8x1xf32>
    %cst_48 = arith.constant 3.200000e+01 : f32
    %88 = vector.broadcast %cst_48 : f32 to vector<8x1xf32>
    %89 = arith.divf %87, %88 : vector<8x1xf32>
    %cst_49 = arith.constant 9.99999974E-6 : f32
    %90 = vector.broadcast %cst_49 : f32 to vector<8x1xf32>
    %91 = arith.addf %89, %90 : vector<8x1xf32>
    %92 = math.rsqrt %91 : vector<8x1xf32>
    %93 = vector.broadcast %92 : vector<8x1xf32> to vector<8x32xf32>
    %94 = arith.mulf %84, %93 : vector<8x32xf32>
    %c0_50 = arith.constant 0 : index
    %c0_51 = arith.constant 0 : index
    %95 = vector.load %arg13[%c0_50, %c0_51] : memref<1x32xf32, #tpu.memory_space<vmem>>, vector<1x32xf32>
    %96 = vector.broadcast %95 : vector<1x32xf32> to vector<8x32xf32>
    %97 = arith.mulf %94, %96 : vector<8x32xf32>
    %c0_52 = arith.constant 0 : index
    %c0_53 = arith.constant 0 : index
    %98 = vector.load %arg14[%c0_52, %c0_53] : memref<1x32xf32, #tpu.memory_space<vmem>>, vector<1x32xf32>
    %99 = vector.broadcast %98 : vector<1x32xf32> to vector<8x32xf32>
    %100 = arith.addf %97, %99 : vector<8x32xf32>
    %c0_54 = arith.constant 0 : index
    %c0_55 = arith.constant 0 : index
    %c0_56 = arith.constant 0 : index
    %101 = vector.load %arg15[%c0_54, %c0_55, %c0_56] : memref<1x8x32xf32, #tpu.memory_space<vmem>>, vector<1x8x32xf32>
    %102 = vector.shape_cast %101 : vector<1x8x32xf32> to vector<8x32xf32>
    %103 = vector.shape_cast %100 : vector<8x32xf32> to vector<1x8x32xf32>
    tpu.vector_store %arg15[%c0_54, %c0_55, %c0_56], %103 {strides = array<i32>} : memref<1x8x32xf32, #tpu.memory_space<vmem>>, vector<1x8x32xf32>,
    return
  }
  func.func @transform_0(%arg0: i32, %arg1: i32) -> (i32, i32, i32) {
    %c0_i32 = arith.constant 0 : i32
    %c0_i32_0 = arith.constant 0 : i32
    %c0_i32_1 = arith.constant 0 : i32
    return %arg0, %c0_i32, %c0_i32_0 : i32, i32, i32
  }
  func.func @transform_1(%arg0: i32, %arg1: i32) -> (i32, i32) {
    %c0_i32 = arith.constant 0 : i32
    %c0_i32_0 = arith.constant 0 : i32
    %c0_i32_1 = arith.constant 0 : i32
    return %c0_i32, %c0_i32_0 : i32, i32
  }
  func.func @transform_2(%arg0: i32, %arg1: i32) -> (i32, i32) {
    %c0_i32 = arith.constant 0 : i32
    %c0_i32_0 = arith.constant 0 : i32
    %c0_i32_1 = arith.constant 0 : i32
    return %c0_i32, %c0_i32_0 : i32, i32
  }
  func.func @transform_3(%arg0: i32, %arg1: i32) -> (i32, i32) {
    %c0_i32 = arith.constant 0 : i32
    %c0_i32_0 = arith.constant 0 : i32
    %c0_i32_1 = arith.constant 0 : i32
    return %c0_i32, %c0_i32_0 : i32, i32
  }
  func.func @transform_4(%arg0: i32, %arg1: i32) -> (i32, i32) {
    %c0_i32 = arith.constant 0 : i32
    %c0_i32_0 = arith.constant 0 : i32
    %c0_i32_1 = arith.constant 0 : i32
    return %c0_i32, %c0_i32_0 : i32, i32
  }
  func.func @transform_5(%arg0: i32, %arg1: i32) -> (i32, i32) {
    %c0_i32 = arith.constant 0 : i32
    %c0_i32_0 = arith.constant 0 : i32
    %c0_i32_1 = arith.constant 0 : i32
    return %c0_i32, %c0_i32_0 : i32, i32
  }
  func.func @transform_6(%arg0: i32, %arg1: i32) -> (i32, i32) {
    %c0_i32 = arith.constant 0 : i32
    %c0_i32_0 = arith.constant 0 : i32
    %c0_i32_1 = arith.constant 0 : i32
    return %c0_i32, %c0_i32_0 : i32, i32
  }
  func.func @transform_7(%arg0: i32, %arg1: i32) -> (i32, i32) {
    %c0_i32 = arith.constant 0 : i32
    %c0_i32_0 = arith.constant 0 : i32
    %c0_i32_1 = arith.constant 0 : i32
    return %c0_i32, %c0_i32_0 : i32, i32
  }
  func.func @transform_8(%arg0: i32, %arg1: i32) -> (i32, i32) {
    %c0_i32 = arith.constant 0 : i32
    %c0_i32_0 = arith.constant 0 : i32
    %c0_i32_1 = arith.constant 0 : i32
    return %c0_i32, %c0_i32_0 : i32, i32
  }
  func.func @transform_9(%arg0: i32, %arg1: i32) -> (i32, i32) {
    %c0_i32 = arith.constant 0 : i32
    %c0_i32_0 = arith.constant 0 : i32
    %c0_i32_1 = arith.constant 0 : i32
    return %c0_i32, %c0_i32_0 : i32, i32
  }
  func.func @transform_10(%arg0: i32, %arg1: i32) -> (i32, i32) {
    %c0_i32 = arith.constant 0 : i32
    %c0_i32_0 = arith.constant 0 : i32
    %c0_i32_1 = arith.constant 0 : i32
    return %c0_i32, %c0_i32_0 : i32, i32
  }
  func.func @transform_11(%arg0: i32, %arg1: i32) -> (i32, i32) {
    %c0_i32 = arith.constant 0 : i32
    %c0_i32_0 = arith.constant 0 : i32
    %c0_i32_1 = arith.constant 0 : i32
    return %c0_i32, %c0_i32_0 : i32, i32
  }
  func.func @transform_12(%arg0: i32, %arg1: i32) -> (i32, i32) {
    %c0_i32 = arith.constant 0 : i32
    %c0_i32_0 = arith.constant 0 : i32
    %c0_i32_1 = arith.constant 0 : i32
    return %c0_i32, %c0_i32_0 : i32, i32
  }
  func.func @transform_13(%arg0: i32, %arg1: i32) -> (i32, i32, i32) {
    %c0_i32 = arith.constant 0 : i32
    %c0_i32_0 = arith.constant 0 : i32
    return %arg0, %arg1, %c0_i32 : i32, i32, i32
  }
}

</mosaic_0001>

<bundles_post_ra>
// kernel: tpu_custom_call.1
= control target key start
LH: loop header
LB: loop body
LE: loop exit
PB: predicated region body
PF: predicated region fallthrough
CT: control target
= control target key end

     0   :  { %s2362_s0 = inlined_call_operand.vmem [shape: f32[2,8,32], index: 0, kind: input, shape index: {}]   ;;  %s2363_s1 = inlined_call_operand.vmem [shape: bf16[32,96], index: 1, kind: input, shape index: {}]   ;;  %s2364_s2 = inlined_call_operand.vmem [shape: f32[1,96], index: 2, kind: input, shape index: {}]   ;;  %s2365_s3 = inlined_call_operand.vmem [shape: bf16[32,32], index: 3, kind: input, shape index: {}]   ;;  %s2366_s4 = inlined_call_operand.vmem [shape: f32[1,32], index: 4, kind: input, shape index: {}]   ;;  %s2367_s5 = inlined_call_operand.hbm [shape: bf16[32,64], index: 5, kind: input, shape index: {}]   ;;  %s2368_s6 = inlined_call_operand.vmem [shape: f32[1,64], index: 6, kind: input, shape index: {}]   ;;  %s2369_s7 = inlined_call_operand.vmem [shape: bf16[64,32], index: 7, kind: input, shape index: {}]   ;;  %s2370_s8 = inlined_call_operand.vmem [shape: f32[1,32], index: 8, kind: input, shape index: {}]   ;;  %s2371_s9 = inlined_call_operand.vmem [shape: f32[1,32], index: 9, kind: input, shape index: {}]   ;;  %s2372_s10 = inlined_call_operand.vmem [shape: f32[1,32], index: 10, kind: input, shape index: {}]   ;;  %s2373_s11 = inlined_call_operand.vmem [shape: f32[1,32], index: 11, kind: input, shape index: {}]   ;;  %s2374_s12 = inlined_call_operand.vmem [shape: f32[1,32], index: 12, kind: input, shape index: {}]   ;;  %s2375_s13 = inlined_call_operand.hbm [shape: f32[2,8,32], index: 13, kind: output, shape index: {}]  }
   0x1   :  { %2380 = sst [smem:[#allocation15_spill]] %s2367_s5 }
   0x2   :  { %18 = vsyncpa [#allocation5], 0 }
   0x3   :  { %19 = vsyncpa [#allocation6], 0 }
   0x4   :  { %21 = vsyncpa [#allocation6 + $0x1], 0  ;;  %s1994_s25 = smov 0   ;;  %s1996_s26 = smov 0  }
   0x5   :  { %s1998_s27 = smov 0   ;;  %s2000_s28 = smov 0  }
   0x6   :  { %s2002_s29 = smov 0   ;;  %s2004_s30 = smov 0  }
   0x7 LB: > { %2381 = sst [smem:[#allocation10_spill]] %s1889_s25  ;;  %s1592_s14 = sadd.s32 4294967295, %s1909_s30   ;;  %s1909_s30 = sphi %s2004_s30, %s27_s30   ;;  %s1905_s29 = sphi %s2002_s29, %s2393_s29   ;;  %s1901_s28 = sphi %s2000_s28, %s2392_s28   ;;  %s1897_s27 = sphi %s1998_s27, %s2391_s27   ;;  %s1893_s26 = sphi %s1996_s26, %s2395_s26   ;;  %s1889_s25 = sphi %s1994_s25, %s2394_s25  }
   0x8   : > { %2382 = sst [smem:[#allocation11_spill]] %s1897_s27  ;;  %s1593_s15 = sadd.s32 4294967294, %s1909_s30  }
   0x9   : > { %2383 = sst [smem:[#allocation12_spill]] %s1905_s29  ;;  %s39_s16 = sadd.s32 1, %s1905_s29 }
   0xa   : > { %s326_s17 = sadd.s32 1, %s1897_s27  ;;  %p41_p0 = scmp.ge.s32.totalorder %s39_s16, 2 }
   0xb   : > { %p336_p1 = scmp.ne.s32.totalorder %s1897_s27, %s1893_s26  ;;  %p337_p2 = scmp.eq.s32.totalorder %s1592_s14, 1 }
   0xc   : > { %p342_p3 = scmp.ne.s32.totalorder %s1893_s26, %s1889_s25  ;;  %s2397_s16 = smov (%p41_p0, %s39_s16), 0 }
   0xd   : > { %2384 = sst [smem:[#allocation13_spill]] %s2397_s16  ;;  %p2034_p4 = por %p337_p2, %p336_p1 }
   0xe   : > { %p343_p5 = scmp.eq.s32.totalorder %s1593_s15, 1  ;;  %s321_s19 = ssub.s32 %s1905_s29, %s2397_s16 }
   0xf   : > { %p1594_p6 = scmp.ge.s32.totalorder %s1909_s30, 1  ;;  %p324_p7 = scmp.eq.s32.totalorder %s321_s19, 0 }
  0x10   : > { %p2041_p8 = por %p343_p5, %p342_p3  ;;  %p350_p9 = scmp.lt.s32.totalorder %s1909_s30, 3 }
  0x11   : > { %s2047_s21 = scalar_select %p324_p7, %s1897_s27, %s326_s17  }
  0x12   : > { %p351_p10 = pnand %p1594_p6, %p350_p9  ;;  %p1692_p11 = scmp.eq.s32.totalorder %s1592_s14, 0 }
  0x13   : > { %2387 = sst [smem:[#allocation14_spill]] %s2047_s21  ;;  %s1911_s25 = smov [#allocation4]  }
  0x14   : > { %s2388_s5 = sld [smem:[#allocation15_spill]]  ;;  %p1684_p12 = pneg %p351_p10 }
  0x15   : > { %s375_s15 = sshll.u32 %s1911_s25, 4  ;;  %s1912_s19 = smov 64   ;;  %s376_s15 = int_to_ptr.vmem [resolvable:$true] %s375_s15 }
  0x16   : > { %p1685_p13 = pnand %p1692_p11, %p1684_p12  ;;  %s1913_s16 = smov 4  }
  0x17   : > { %419 = sbr.rel (%p351_p10) target bundleno = 1928 (0x788), region = 72 }
  0x1a   : > { %s373_s24 = sshll.u32 %s2388_s5, 4  ;;  %s374_s24 = int_to_ptr.hbm [resolvable:$true] %s373_s24 }
  0x1b   : > { %1687 = dma.hbm_to_vmem [thread:$0]  (!%p1685_p13), %s374_s24, 256, %s376_s15, [#allocation5], %s1912_s19, %s1912_s19, %s1913_s16  }
  0x1c   : > { %1880 = dma.done.wait (%p1692_p11), [#allocation5], 256  }
  0x1d   : > { %1882 = vsyncadd (%p1692_p11), [#allocation5], 4294967040  ;;  %p463_p0 = scmp.lt.s32.totalorder %s1901_s28, 1  ;;  %v1667_v0 = vld [vmem:[%s2363_s1 + $0x8] sm:$0xff]  ;;  %v1668_v2 = vld [vmem:[%s2363_s1] sm:$0xff]  ;;  %s1914_s15 = smov 96  }
  0x1e   : > { %v1669_v1 = vld [vmem:[%s2363_s1 + $0x8] sm:$0xff]  ;;  %493 = vrot.lane.b32.xlu0 %v1667_v0, %s1914_s15  ;;  %v1666_v5 = vld [vmem:[%s2363_s1] sm:$0xff]  ;;  %vm500_vm0 = vcmask 261120   ;;  %s1916_s22 = smov 112   ;;  %v1918_v21 = vmov 1983009808  }
  0x1f   : > { %s464_s14 = scalar_select %p463_p0, %s1901_s28, 1  ;;  %822 = vmatpush.bf16.msra.mxu1 %v1669_v1  ;;  %v1766_v6 = vld [vmem:[%s2364_s2] ss:$0 sm:$0xff]  ;;  %v533_v22 = vunpack.c.l.s4 %v1918_v21  ;;  %vm528_vm1 = vcmask 1047556   ;;  %v1919_v31 = vmov 1934713408  }
  0x20   : > { %497 = vrot.lane.b32.xlu1 %v1766_v6, %s1914_s15  ;;  %v1767_v9 = vld [vmem:[%s2364_s2] ss:$0 sm:$0xff]  ;;  %v557_v32 = vunpack.c.l.s4 %v1919_v31  ;;  %vm725_vm2 = vcmask 60416   ;;  %vm959_vm3 = vcmask 64512   ;;  %vm1083_vm4 = vcmask 1043456   ;;  %s1920_s25 = smov 24  }
  0x21   : > { %s1600_s17 = sshll.u32 %s464_s14, 3  ;;  %v2090_v27 = vunpack.c.0.s8 %v533_v22  ;;  %s1921_s16 = smov 16   ;;  %vm1288_vm5 = vcmask 130048   ;;  %vm1290_vm6 = vcmask 195584   ;;  %vm1444_vm11 = vcmask 523264  }
  0x22   : > { %s466_s23 = scalar_lea.vmem %s2362_s0, %s1600_s17  ;;  %s1915_s17 = smov 120   ;;  %v2097_v38 = vunpack.c.0.s8 %v557_v32 }
  0x23   : > { %v2066_v3 = vld [vmem:[%s466_s23] sm:$0xff]  ;;  %823 = vmatpush.bf16.msra.mxu1 %v1668_v2  ;;  %s1917_s23 = smov 104   ;;  %s1922_s24 = smov 8  }
  0x24   : > { %v791_v4 = vpack.c.bf16 %v2066_v3, %v2066_v3 }
  0x26   : > { %1618 = vmatmul.msk.bf16.vlgmr.msra.gmra.mxu1 %vm500_vm0, %v791_v4  ;;  %491 = vrot.lane.b32.xlu0 %v1666_v5, %s1914_s15 }
  0x90   : > { %v494_v7 = vpop.permute.xlu0 %493 }
  0x91   : > { %510 = vmatpush.bf16.msra.mxu0 %v494_v7 }
  0x92   : > { %v498_v14 = vpop.permute.xlu1 %497 }
  0x98   : > { %v492_v8 = vpop.permute.xlu0 %491 }
  0x99   : > { %511 = vmatpush.bf16.msra.mxu0 %v492_v8 }
  0x9c   : > { %1609 = vmatmul.msk.bf16.vlgmr.msra.gmra.mxu0 %vm500_vm0, %v791_v4 }
  0xa3   : > { %v825_v10 = vpop.f32.mrf.mxu1 }
  0xa4   : > { %v826_v11 = vadd.f32 %v1767_v9, %v825_v10 }
  0xa6   : > { %v2084_v12 = vmul.f32 0.35355338, %v826_v11 }
  0xa8   : > { %831 = vrot.lane.b32.xlu0 %v2084_v12, %s1915_s17  ;;  %v843_v63 = vrot.slane %v2084_v12, 4 }
  0xab   : > { %v827_v13 = vpop.f32.mrf.mxu1 }
 0x119   : > { %v513_v15 = vpop.f32.mrf.mxu0 }
 0x11a   : > { %v514_v16 = vadd.f32 %v513_v15, %v498_v14  ;;  %v832_v24 = vpop.permute.xlu0 %831 }
 0x11b   : > { %v855_v30 = vrot.slane %v832_v24, 4 }
 0x11c   : > { %521 = vrot.lane.b32.xlu2 %v514_v16, %s1916_s22  ;;  %518 = vrot.lane.b32.xlu1 %v514_v16, %s1915_s17  ;;  %v530_v25 = vrot.slane %v514_v16, 4 }
 0x121   : > { %v515_v17 = vpop.f32.mrf.mxu0 }
 0x124   : > { %524 = vrot.lane.b32.xlu2 %v514_v16, %s1917_s23  ;;  %834 = vrot.lane.b32.xlu1 %v2084_v12, %s1916_s22 }
 0x12c   : > { %837 = vrot.lane.b32.xlu2 %v2084_v12, %s1917_s23  ;;  %s460_s23 = sand.u32 1, %s1893_s26  }
 0x12d   : > { %s1496_s22 = scalar_lea.sflag [#allocation6], %s460_s23 }
 0x176   : > { %v522_v18 = vpop.permute.xlu2 %521 }
 0x177   : > { %v527_v23 = vrot.slane %v522_v18, 4  ;;  %v531_v29 = vsel %vm528_vm1, %v522_v18, %v530_v25 }
 0x178   : > { %v539_v35 = vperm.slane %v531_v29, %v2090_v27 }
 0x179   : > { %v529_v28 = vsel %vm528_vm1, %v527_v23, %v514_v16 }
 0x17a   : > { %v535_v34 = vperm.slane %v529_v28, %v2090_v27  ;;  %v566_v46 = vrot.slane %v539_v35, 4 }
 0x17c   : > { %v554_v44 = vrot.slane %v535_v34, 4 }
 0x17e   : > { %v525_v19 = vpop.permute.xlu2 %524 }
 0x17f   : > { %v1761_v20 = vpack.i.bf16 %v525_v19, %v522_v18  ;;  %v540_v36 = vrot.slane %v525_v19, 4 }
 0x181   : > { %1762 = vrot.lane.b32.xlu1 %v1761_v20, %s1914_s15 }
 0x186   : > { %v838_v26 = vpop.permute.xlu2 %837 }
 0x187   : > { %v853_v33 = vrot.slane %v838_v26, 4  ;;  %v856_v37 = vsel %vm528_vm1, %v838_v26, %v855_v30 }
 0x188   : > { %v2103_v47 = vperm.slane %v856_v37, %v2090_v27 }
 0x189   : > { %v854_v40 = vsel %vm528_vm1, %v853_v33, %v832_v24 }
 0x18a   : > { %v860_v49 = vperm.slane %v854_v40, %v2090_v27  ;;  %v877_v61 = vrot.slane %v2103_v47, 4 }
 0x18c   : > { %v865_v60 = vrot.slane %v860_v49, 4 }
 0x18e   : > { %v519_v39 = vpop.permute.xlu1 %518 }
 0x18f   : > { %v541_v41 = vsel %vm528_vm1, %v540_v36, %v519_v39  ;;  %v542_v42 = vrot.slane %v519_v39, 4  ;;  %v1756_v43 = vpack.i.bf16 %v519_v39, %v514_v16 }
 0x190   : > { %v547_v45 = vperm.slane %v541_v41, %v2090_v27 }
 0x191   : > { %v543_v48 = vsel %vm528_vm1, %v525_v19, %v542_v42  ;;  %1757 = vrot.lane.b32.xlu0 %v1756_v43, %s1914_s15 }
 0x192   : > { %v551_v50 = vperm.slane %v543_v48, %v2090_v27  ;;  %v552_v51 = vrot.slane %v547_v45, 4  ;;  %v555_v52 = vsel %vm528_vm1, %v547_v45, %v554_v44 }
 0x193   : > { %v563_v53 = vperm.slane %v555_v52, %v2097_v38 }
 0x194   : > { %v553_v54 = vsel %vm528_vm1, %v552_v51, %v535_v34  ;;  %v564_v55 = vrot.slane %v551_v50, 4  ;;  %v567_v56 = vsel %vm528_vm1, %v551_v50, %v566_v46 }
 0x195   : > { %v559_v57 = vperm.slane %v553_v54, %v2097_v38  ;;  %v578_v58 = vrot.slane %v563_v53, 4  ;;  %v575_v59 = vperm.slane %v567_v56, %v2097_v38  ;;  %v586_v4 = vpack.c.bf16 %v563_v53, %v563_v53 }
 0x196   : > { %v565_v62 = vsel %vm528_vm1, %v564_v55, %v539_v35  ;;  %v835_v0 = vpop.permute.xlu1 %834 }
 0x197   : > { %v576_v1 = vrot.slane %v559_v57, 4  ;;  %v579_v2 = vsel %vm528_vm1, 0.0, %v578_v58  ;;  %v571_v5 = vperm.slane %v565_v62, %v2097_v38  ;;  %v584_v6 = vpack.c.bf16 %v559_v57, %v559_v57 }
 0x198   : > { %v582_v7 = vrot.slane %v575_v59, 4  ;;  %v590_v8 = vpack.c.bf16 %v575_v59, %v575_v59  ;;  %v840_v9 = vrot.slane %v835_v0, 4  ;;  %v844_v14 = vsel %vm528_vm1, %v835_v0, %v843_v63 }
 0x199   : > { %v577_v10 = vsel %vm528_vm1, 0.0, %v576_v1  ;;  %v580_v11 = vrot.slane %v571_v5, 4  ;;  %v588_v13 = vpack.c.bf16 %v571_v5, %v571_v5  ;;  %v587_v15 = vpack.c.bf16 %v579_v2, %v579_v2 }
 0x19a   : > { %v583_v16 = vsel %vm528_vm1, 0.0, %v582_v7  ;;  %v675_v17 = vrot.slane %v590_v8, 4  ;;  %v842_v18 = vsel %vm528_vm1, %v840_v9, %v2084_v12  ;;  %v585_v23 = vpack.c.bf16 %v577_v10, %v577_v10 }
 0x19b   : > { %v581_v19 = vsel %vm528_vm1, 0.0, %v580_v11  ;;  %v591_v20 = vpack.c.bf16 %v583_v16, %v583_v16  ;;  %v668_v21 = vrot.slane %v588_v13, 4  ;;  %v848_v22 = vperm.slane %v842_v18, %v2090_v27 }
 0x19c   : > { %v589_v24 = vpack.c.bf16 %v581_v19, %v581_v19  ;;  %v676_v25 = vsel %vm528_vm1, %v675_v17, %v586_v4  ;;  %v852_v26 = vperm.slane %v844_v14, %v2090_v27 }
 0x19d   : > { %v670_v28 = vsel %vm528_vm1, %v668_v21, %v584_v6  ;;  %v680_v29 = vperm.slane %v676_v25, %v2090_v27  ;;  %v695_v30 = vrot.slane %v591_v20, 4  ;;  %v866_v31 = vsel %vm528_vm1, %v865_v60, %v848_v22 }
 0x19e   : > { %v674_v12 = vperm.slane %v670_v28, %v2090_v27  ;;  %v689_v32 = vrot.slane %v589_v24, 4  ;;  %v867_v33 = vrot.slane %v848_v22, 4  ;;  %v872_v34 = vperm.slane %v866_v31, %v2097_v38 }
 0x19f   : > { %v681_v35 = vrot.slane %v680_v29, 4  ;;  %v696_v36 = vsel %vm528_vm1, %v695_v30, %v587_v15  ;;  %v878_v37 = vsel %vm528_vm1, %v877_v61, %v852_v26  ;;  %v879_v39 = vrot.slane %v852_v26, 4 }
 0x1a0   : > { %v690_v40 = vsel %vm528_vm1, %v689_v32, %v585_v23  ;;  %v700_v41 = vperm.slane %v696_v36, %v2090_v27  ;;  %v868_v42 = vsel %vm528_vm1, %v860_v49, %v867_v33  ;;  %v884_v43 = vperm.slane %v878_v37, %v2097_v38 }
 0x1a1   : > { %v682_v44 = vsel %vm528_vm1, %v681_v35, %v674_v12  ;;  %v694_v45 = vperm.slane %v690_v40, %v2090_v27  ;;  %v876_v46 = vperm.slane %v868_v42, %v2097_v38  ;;  %v880_v48 = vsel %vm528_vm1, %v2103_v47, %v879_v39 }
 0x1a2   : > { %v686_v50 = vperm.slane %v682_v44, %v2097_v38  ;;  %v701_v51 = vrot.slane %v700_v41, 4  ;;  %v888_v52 = vperm.slane %v880_v48, %v2097_v38  ;;  %v889_v53 = vrot.slane %v872_v34, 4 }
 0x1a3   : > { %v891_v54 = vrot.slane %v876_v46, 4  ;;  %v893_v55 = vrot.slane %v884_v43, 4 }
 0x1a4   : > { %v687_v49 = vrot.slane %v686_v50, 4  ;;  %v702_v56 = vsel %vm528_vm1, %v701_v51, %v694_v45  ;;  %v713_v57 = vshrl.u32 %v686_v50, 16  ;;  %v890_v59 = vsel %vm528_vm1, 0.0, %v889_v53 }
 0x1a5   : > { %v706_v58 = vperm.slane %v702_v56, %v2097_v38  ;;  %v892_v60 = vsel %vm528_vm1, 0.0, %v891_v54  ;;  %v895_v47 = vrot.slane %v888_v52, 4  ;;  %v894_v62 = vsel %vm528_vm1, 0.0, %v893_v55 }
 0x1a6   : > { %v688_v61 = vsel %vm528_vm1, 0, %v687_v49  ;;  %v902_v63 = vrot.slane %v892_v60, 4  ;;  %v897_v0 = vsel %vm528_vm1, %v891_v54, %v872_v34 }
 0x1a7   : > { %v707_v1 = vrot.slane %v706_v58, 4  ;;  %v711_v2 = vpack.i.b16 %v706_v58, %v686_v50  ;;  %v714_v4 = vshrl.u32 %v706_v58, 16  ;;  %v721_v5 = vshrl.u32 %v688_v61, 16 }
 0x1a8   : > { %v896_v6 = vsel %vm528_vm1, 0.0, %v895_v47  ;;  %v908_v7 = vsel %vm528_vm1, %v895_v47, %v884_v43  ;;  %v901_v8 = vperm.slane %v897_v0, %v2090_v27  ;;  %v903_v9 = vsel %vm528_vm1, %v902_v63, %v890_v59 }
 0x1a9   : > { %v708_v10 = vsel %vm528_vm1, 0, %v707_v1  ;;  %v715_v11 = vpack.i.b16 %v714_v4, %v713_v57  ;;  %726 = vst.msk [vmem:[#allocation2] sm:$0xf] %vm725_vm2, %v711_v2  ;;  %v912_v13 = vperm.slane %v908_v7, %v2090_v27  ;;  %v913_v14 = vrot.slane %v896_v6, 4 }
 0x1aa   : > { %v719_v15 = vpack.i.b16 %v708_v10, %v688_v61  ;;  %v722_v16 = vshrl.u32 %v708_v10, 16  ;;  %v907_v17 = vperm.slane %v903_v9, %v2090_v27  ;;  %v921_v18 = vrot.slane %v901_v8, 4 }
 0x1ab   : > { %727 = vst.msk [vmem:[#allocation2 + $0x4] sm:$0xf] %vm725_vm2, %v715_v11  ;;  %v914_v19 = vsel %vm528_vm1, %v913_v14, %v894_v62  ;;  %v933_v20 = vrot.slane %v912_v13, 4 }
 0x1ac   : > { %v723_v21 = vpack.i.b16 %v722_v16, %v721_v5  ;;  %728 = vst.msk [vmem:[#allocation2 + $0x8] sm:$0xf] %vm725_vm2, %v719_v15  ;;  %v918_v22 = vperm.slane %v914_v19, %v2090_v27  ;;  %v919_v23 = vrot.slane %v907_v17, 4  ;;  %v922_v26 = vsel %vm528_vm1, %v907_v17, %v921_v18 }
 0x1ad   : > { %v930_v34 = vperm.slane %v922_v26, %v2097_v38 }
 0x1ae   : > { %729 = vst.msk [vmem:[#allocation2 + $0xc] sm:$0xf] %vm725_vm2, %v723_v21  ;;  %v920_v24 = vsel %vm528_vm1, %v919_v23, %v901_v8  ;;  %v931_v25 = vrot.slane %v918_v22, 4  ;;  %v934_v28 = vsel %vm528_vm1, %v918_v22, %v933_v20 }
 0x1af   : > { %v926_v29 = vperm.slane %v920_v24, %v2097_v38  ;;  %v942_v30 = vperm.slane %v934_v28, %v2097_v38  ;;  %v949_v45 = vrot.slane %v930_v34, 4 }
 0x1b0   : > { %v955_v31 = vld [vmem:[#allocation2] sm:$0xf]  ;;  %v932_v12 = vsel %vm528_vm1, %v931_v25, %v912_v13 }
 0x1b1   : > { %v964_v32 = vsel %vm959_vm3, %v955_v31, 0  ;;  %v938_v33 = vperm.slane %v932_v12, %v2097_v38  ;;  %v945_v36 = vrot.slane %v926_v29, 4  ;;  %v947_v41 = vrot.slane %v942_v30, 4 }
 0x1b2   : > { %973 = vmatpush.bf16.xpose.msra.mxu2 %v964_v32  ;;  %v956_v35 = vld [vmem:[#allocation2 + $0x4] sm:$0xf]  ;;  %v950_v53 = vsel %vm528_vm1, %v942_v30, %v949_v45 }
 0x1b3   : > { %v983_v37 = vsel %vm959_vm3, %v956_v35, 0  ;;  %v957_v39 = vld [vmem:[#allocation2 + $0x8] sm:$0xf]  ;;  %v943_v40 = vrot.slane %v938_v33, 4  ;;  %v946_v48 = vsel %vm528_vm1, %v938_v33, %v945_v36  ;;  %v948_v51 = vsel %vm528_vm1, %v947_v41, %v930_v34 }
 0x1b4   : > { %992 = vmatpush.bf16.xpose.msra.mxu3 %v983_v37  ;;  %v1002_v42 = vsel %vm959_vm3, %v957_v39, 0  ;;  %v952_v52 = vpack.c.bf16 %v946_v48, %v946_v48  ;;  %v953_v54 = vpack.c.bf16 %v948_v51, %v948_v51  ;;  %v954_v55 = vpack.c.bf16 %v950_v53, %v950_v53 }
 0x1b5   : > { %1011 = vmatpush.bf16.xpose.msrb.mxu0 %v1002_v42  ;;  %v958_v43 = vld [vmem:[#allocation2 + $0xc] sm:$0xf]  ;;  %v944_v44 = vsel %vm528_vm1, %v943_v40, %v926_v29 }
 0x1b6   : > { %v1021_v46 = vsel %vm959_vm3, %v958_v43, 0  ;;  %v951_v50 = vpack.c.bf16 %v944_v44, %v944_v44 }
 0x1b7   : > { %1030 = vmatpush.bf16.xpose.msrb.mxu1 %v1021_v46 }
 0x1b9   : > { %1619 = vmatmul.msk.bf16.vlgmr.msra.gmra.mxu2 %vm959_vm3, %v951_v50 }
 0x1bb   : > { %1620 = vmatmul.msk.bf16.vlgmr.msra.gmra.mxu3 %vm959_vm3, %v952_v52 }
 0x1bc   : > { %1621 = vmatmul.msk.bf16.vlgmr.msrb.gmra.mxu0 %vm959_vm3, %v953_v54 }
 0x1be   : > { %1622 = vmatmul.msk.bf16.vlgmr.msrb.gmra.mxu1 %vm959_vm3, %v954_v55 }
 0x1f3   : > { %v1763_v49 = vpop.permute.xlu1 %1762 }
 0x1f4   : > { %v1765_v56 = vunpack.i.h.bf16 %v1763_v49  ;;  %v1764_v57 = vunpack.i.l.bf16 %v1763_v49 }
 0x1f6   : > { %v616_v59 = vrot.slane %v1765_v56, 4  ;;  %v604_v60 = vrot.slane %v1764_v57, 4 }
 0x203   : > { %v1758_v58 = vpop.permute.xlu0 %1757 }
 0x204   : > { %v1760_v47 = vunpack.i.h.bf16 %v1758_v58  ;;  %v1759_v61 = vunpack.i.l.bf16 %v1758_v58 }
 0x206   : > { %v618_v62 = vrot.slane %v1760_v47, 4  ;;  %v605_v63 = vsel %vm528_vm1, %v604_v60, %v1759_v61  ;;  %v606_v0 = vrot.slane %v1759_v61, 4  ;;  %v617_v1 = vsel %vm528_vm1, %v616_v59, %v1760_v47 }
 0x207   : > { %v611_v2 = vperm.slane %v605_v63, %v2090_v27  ;;  %v623_v4 = vperm.slane %v617_v1, %v2090_v27 }
 0x208   : > { %v607_v5 = vsel %vm528_vm1, %v1764_v57, %v606_v0  ;;  %v619_v6 = vsel %vm528_vm1, %v1765_v56, %v618_v62 }
 0x209   : > { %v615_v7 = vperm.slane %v607_v5, %v2090_v27  ;;  %v627_v8 = vperm.slane %v619_v6, %v2090_v27  ;;  %v628_v9 = vrot.slane %v623_v4, 4  ;;  %v630_v10 = vrot.slane %v611_v2, 4 }
 0x20b   : > { %v629_v11 = vsel %vm528_vm1, %v628_v9, %v611_v2  ;;  %v631_v13 = vsel %vm528_vm1, %v623_v4, %v630_v10  ;;  %v640_v14 = vrot.slane %v627_v8, 4  ;;  %v642_v15 = vrot.slane %v615_v7, 4 }
 0x20c   : > { %v635_v16 = vperm.slane %v629_v11, %v2097_v38  ;;  %v639_v17 = vperm.slane %v631_v13, %v2097_v38 }
 0x20d   : > { %v641_v18 = vsel %vm528_vm1, %v640_v14, %v615_v7  ;;  %v643_v19 = vsel %vm528_vm1, %v627_v8, %v642_v15 }
 0x20e   : > { %v647_v20 = vperm.slane %v641_v18, %v2097_v38  ;;  %v651_v21 = vperm.slane %v643_v19, %v2097_v38  ;;  %v652_v22 = vrot.slane %v635_v16, 4  ;;  %v654_v23 = vrot.slane %v639_v17, 4 }
 0x20f   : > { %v660_v32 = vpack.c.bf16 %v635_v16, %v635_v16  ;;  %v662_v33 = vpack.c.bf16 %v639_v17, %v639_v17 }
 0x210   : > { %v656_v24 = vrot.slane %v647_v20, 4  ;;  %v658_v25 = vrot.slane %v651_v21, 4  ;;  %v653_v26 = vsel %vm528_vm1, 0.0, %v652_v22  ;;  %v655_v28 = vsel %vm528_vm1, 0.0, %v654_v23 }
 0x211   : > { %v664_v29 = vpack.c.bf16 %v647_v20, %v647_v20  ;;  %v666_v30 = vpack.c.bf16 %v651_v21, %v651_v21  ;;  %v661_v39 = vpack.c.bf16 %v653_v26, %v653_v26  ;;  %v663_v40 = vpack.c.bf16 %v655_v28, %v655_v28 }
 0x212   : > { %v657_v31 = vsel %vm528_vm1, 0.0, %v656_v24  ;;  %v659_v12 = vsel %vm528_vm1, 0.0, %v658_v25 }
 0x213   : > { %v665_v34 = vpack.c.bf16 %v657_v31, %v657_v31  ;;  %v667_v35 = vpack.c.bf16 %v659_v12, %v659_v12  ;;  %v730_v36 = vrot.slane %v664_v29, 4  ;;  %v736_v37 = vrot.slane %v666_v30, 4 }
 0x215   : > { %v731_v41 = vsel %vm528_vm1, %v730_v36, %v660_v32  ;;  %v737_v42 = vsel %vm528_vm1, %v736_v37, %v662_v33  ;;  %v750_v43 = vrot.slane %v665_v34, 4  ;;  %v756_v44 = vrot.slane %v667_v35, 4 }
 0x216   : > { %v741_v45 = vperm.slane %v737_v42, %v2090_v27  ;;  %v735_v50 = vperm.slane %v731_v41, %v2090_v27 }
 0x217   : > { %v751_v46 = vsel %vm528_vm1, %v750_v43, %v661_v39  ;;  %v757_v48 = vsel %vm528_vm1, %v756_v44, %v663_v40 }
 0x218   : > { %v742_v51 = vrot.slane %v741_v45, 4  ;;  %v761_v52 = vperm.slane %v757_v48, %v2090_v27  ;;  %v755_v54 = vperm.slane %v751_v46, %v2090_v27 }
 0x21a   : > { %v743_v53 = vsel %vm528_vm1, %v742_v51, %v735_v50  ;;  %v762_v55 = vrot.slane %v761_v52, 4 }
 0x21b   : > { %v747_v49 = vperm.slane %v743_v53, %v2097_v38 }
 0x21c   : > { %v763_v56 = vsel %vm528_vm1, %v762_v55, %v755_v54 }
 0x21d   : > { %v748_v57 = vrot.slane %v747_v49, 4  ;;  %v767_v58 = vperm.slane %v763_v56, %v2097_v38  ;;  %v774_v59 = vshrl.u32 %v747_v49, 16 }
 0x21f   : > { %v749_v60 = vsel %vm528_vm1, 0, %v748_v57  ;;  %v768_v47 = vrot.slane %v767_v58, 4  ;;  %v772_v61 = vpack.i.b16 %v767_v58, %v747_v49  ;;  %v775_v62 = vshrl.u32 %v767_v58, 16 }
 0x220   : > { %v782_v2 = vshrl.u32 %v749_v60, 16 }
 0x221   : > { %v769_v63 = vsel %vm528_vm1, 0, %v768_v47  ;;  %v776_v0 = vpack.i.b16 %v775_v62, %v774_v59  ;;  %786 = vst.msk [vmem:[#allocation3] sm:$0xf] %vm725_vm2, %v772_v61 }
 0x222   : > { %v780_v1 = vpack.i.b16 %v769_v63, %v749_v60  ;;  %v783_v4 = vshrl.u32 %v769_v63, 16 }
 0x223   : > { %787 = vst.msk [vmem:[#allocation3 + $0x4] sm:$0xf] %vm725_vm2, %v776_v0 }
 0x224   : > { %v784_v5 = vpack.i.b16 %v783_v4, %v782_v2  ;;  %788 = vst.msk [vmem:[#allocation3 + $0x8] sm:$0xf] %vm725_vm2, %v780_v1 }
 0x226   : > { %789 = vst.msk [vmem:[#allocation3 + $0xc] sm:$0xf] %vm725_vm2, %v784_v5 }
 0x228   : > { %v1076_v6 = vld [vmem:[#allocation3] sm:$0xf] }
 0x229   : > { %v1085_v7 = vsel %vm1083_vm4, %v1076_v6, 0 }
 0x22a   : > { %1094 = vmatpush.bf16.msrb.mxu2 %v1085_v7  ;;  %v1077_v8 = vld [vmem:[#allocation3 + $0x4] sm:$0xf] }
 0x22b   : > { %v1104_v9 = vsel %vm1083_vm4, %v1077_v8, 0  ;;  %v1078_v10 = vld [vmem:[#allocation3 + $0x8] sm:$0xf] }
 0x22c   : > { %1113 = vmatpush.bf16.msrb.mxu3 %v1104_v9  ;;  %v1123_v11 = vsel %vm1083_vm4, %v1078_v10, 0 }
 0x22d   : > { %1132 = vmatpush.bf16.msra.mxu0 %v1123_v11  ;;  %v1079_v13 = vld [vmem:[#allocation3 + $0xc] sm:$0xf] }
 0x22e   : > { %v1142_v14 = vsel %vm1083_vm4, %v1079_v13, 0 }
 0x22f   : > { %1151 = vmatpush.bf16.msra.mxu1 %v1142_v14 }
 0x239   : > { %v1013_v15 = vpop.f32.mrf.mxu0 }
 0x23a   : > { %v1042_v16 = vsel %vm959_vm3, %v1013_v15, -inf }
 0x23b   : > { %v1032_v17 = vpop.f32.mrf.mxu1  ;;  %1043 = vmax.xlane.f32.xlu1 %v1042_v16 }
 0x23c   : > { %v975_v18 = vpop.f32.mrf.mxu2  ;;  %v1045_v25 = vsel %vm959_vm3, %v1032_v17, -inf }
 0x23d   : > { %v1036_v19 = vsel %vm959_vm3, %v975_v18, -inf }
 0x23e   : > { %v994_v20 = vpop.f32.mrf.mxu3  ;;  %1037 = vmax.xlane.f32.xlu2 %v1036_v19 }
 0x23f   : > { %v1039_v21 = vsel %vm959_vm3, %v994_v20, -inf }
 0x240   : > { %1040 = vmax.xlane.f32.xlu0 %v1039_v21 }
 0x241   : > { %v1015_v22 = vpop.f32.mrf.mxu0 }
 0x243   : > { %v1034_v23 = vpop.f32.mrf.mxu1 }
 0x244   : > { %v977_v24 = vpop.f32.mrf.mxu2 }
 0x246   : > { %v996_v26 = vpop.f32.mrf.mxu3  ;;  %1046 = vmax.xlane.f32.xlu2 %v1045_v25 }
 0x2ae   : > { %v1044_v28 = vpop.xlane.xlu1 %1043 }
 0x2af   : > { %v1050_v29 = vsub.f32 %v1013_v15, %v1044_v28 }
 0x2b1   : > { %v1056_v30 = vmul.f32 1.442695, %v1050_v29  ;;  %v1038_v31 = vpop.xlane.xlu2 %1037 }
 0x2b2   : > { %v1048_v12 = vsub.f32 %v975_v18, %v1038_v31 }
 0x2b3   : > { %1775 = vpow2.f32 %v1056_v30  ;;  %v1041_v32 = vpop.xlane.xlu0 %1040 }
 0x2b4   : > { %v1052_v33 = vmul.f32 1.442695, %v1048_v12  ;;  %v1049_v34 = vsub.f32 %v994_v20, %v1041_v32 }
 0x2b6   : > { %1777 = vpow2.f32 %v1052_v33  ;;  %v1054_v35 = vmul.f32 1.442695, %v1049_v34 }
 0x2b8   : > { %1779 = vpow2.f32 %v1054_v35 }
 0x2b9   : > { %v1776_v36 = vpop.eup %1775  ;;  %v1047_v37 = vpop.xlane.xlu2 %1046 }
 0x2ba   : > { %v1074_v39 = vpack.c.bf16 %v1776_v36, %v1776_v36  ;;  %v1051_v40 = vsub.f32 %v1032_v17, %v1047_v37  ;;  %v1066_v41 = vsel %vm959_vm3, %v1776_v36, 0.0 }
 0x2bb   : > { %1067 = vadd.xlane.f32.xlu2 %v1066_v41 }
 0x2bc   : > { %v1778_v42 = vpop.eup %1777  ;;  %v1058_v43 = vmul.f32 1.442695, %v1051_v40  ;;  %1625 = vmatmul.msk.bf16.vlgmr.msra.gmra.mxu0 %vm959_vm3, %v1074_v39 }
 0x2bd   : > { %v1060_v44 = vsel %vm959_vm3, %v1778_v42, 0.0  ;;  %v1072_v45 = vpack.c.bf16 %v1778_v42, %v1778_v42 }
 0x2be   : > { %v1780_v46 = vpop.eup %1779  ;;  %1781 = vpow2.f32 %v1058_v43  ;;  %1061 = vadd.xlane.f32.xlu0 %v1060_v44 }
 0x2bf   : > { %1623 = vmatmul.msk.bf16.vlgmr.msrb.gmra.mxu2 %vm959_vm3, %v1072_v45  ;;  %v1073_v48 = vpack.c.bf16 %v1780_v46, %v1780_v46  ;;  %v1063_v50 = vsel %vm959_vm3, %v1780_v46, 0.0 }
 0x2c1   : > { %1624 = vmatmul.msk.bf16.vlgmr.msrb.gmra.mxu3 %vm959_vm3, %v1073_v48 }
 0x2c3   : > { %1064 = vadd.xlane.f32.xlu2 %v1063_v50 }
 0x2c4   : > { %v1782_v51 = vpop.eup %1781 }
 0x2c5   : > { %v1075_v52 = vpack.c.bf16 %v1782_v51, %v1782_v51  ;;  %v1069_v53 = vsel %vm959_vm3, %v1782_v51, 0.0 }
 0x2c6   : > { %1070 = vadd.xlane.f32.xlu1 %v1069_v53 }
 0x2c7   : > { %1626 = vmatmul.msk.bf16.vlgmr.msra.gmra.mxu1 %vm959_vm3, %v1075_v52 }
 0x32e   : > { %v1068_v54 = vpop.xlane.xlu2 %1067 }
 0x32f   : > { %1783 = vrcp.f32 %v1068_v54 }
 0x331   : > { %v1062_v55 = vpop.xlane.xlu0 %1061 }
 0x332   : > { %1785 = vrcp.f32 %v1062_v55 }
 0x335   : > { %v1784_v58 = vpop.eup %1783 }
 0x336   : > { %v1065_v56 = vpop.xlane.xlu2 %1064 }
 0x337   : > { %1787 = vrcp.f32 %v1065_v56 }
 0x338   : > { %v1786_v47 = vpop.eup %1785 }
 0x339   : > { %v1134_v49 = vpop.f32.mrf.mxu0  ;;  %v1071_v57 = vpop.xlane.xlu1 %1070 }
 0x33a   : > { %1789 = vrcp.f32 %v1071_v57  ;;  %v1163_v59 = vmul.f32 %v1784_v58, %v1134_v49 }
 0x33c   : > { %v1165_v63 = vrot.slane %v1163_v59, 4 }
 0x33d   : > { %v1788_v62 = vpop.eup %1787 }
 0x340   : > { %v1790_v1 = vpop.eup %1789 }
 0x341   : > { %v1136_v60 = vpop.f32.mrf.mxu0 }
 0x342   : > { %v1096_v61 = vpop.f32.mrf.mxu2 }
 0x343   : > { %v1161_v0 = vmul.f32 %v1786_v47, %v1096_v61 }
 0x344   : > { %v1115_v2 = vpop.f32.mrf.mxu3  ;;  %v1153_v4 = vpop.f32.mrf.mxu1 }
 0x345   : > { %v1166_v5 = vsel %vm528_vm1, %v1165_v63, %v1161_v0  ;;  %v1167_v6 = vrot.slane %v1161_v0, 4  ;;  %v1162_v7 = vmul.f32 %v1788_v62, %v1115_v2  ;;  %v1164_v8 = vmul.f32 %v1790_v1, %v1153_v4 }
 0x346   : > { %v1172_v9 = vperm.slane %v1166_v5, %v2090_v27 }
 0x347   : > { %v1168_v10 = vsel %vm528_vm1, %v1163_v59, %v1167_v6  ;;  %v1179_v11 = vrot.slane %v1162_v7, 4  ;;  %v1177_v13 = vrot.slane %v1164_v8, 4 }
 0x348   : > { %v1176_v14 = vperm.slane %v1168_v10, %v2090_v27  ;;  %v1191_v17 = vrot.slane %v1172_v9, 4 }
 0x349   : > { %v1178_v15 = vsel %vm528_vm1, %v1177_v13, %v1162_v7  ;;  %v1180_v16 = vsel %vm528_vm1, %v1164_v8, %v1179_v11 }
 0x34a   : > { %v1203_v18 = vrot.slane %v1176_v14, 4  ;;  %v1184_v19 = vperm.slane %v1178_v15, %v2090_v27  ;;  %v1188_v20 = vperm.slane %v1180_v16, %v2090_v27  ;;  %v1098_v21 = vpop.f32.mrf.mxu2 }
 0x34c   : > { %v1189_v22 = vrot.slane %v1184_v19, 4  ;;  %v1192_v23 = vsel %vm528_vm1, %v1184_v19, %v1191_v17  ;;  %v1201_v24 = vrot.slane %v1188_v20, 4  ;;  %v1204_v25 = vsel %vm528_vm1, %v1188_v20, %v1203_v18  ;;  %v1117_v26 = vpop.f32.mrf.mxu3  ;;  %v1155_v28 = vpop.f32.mrf.mxu1  ;;  %v1768_v18 = vld [vmem:[%s2366_s4] ss:$0 sm:$0xff] }
 0x34d   : > { %v1200_v29 = vperm.slane %v1192_v23, %v2097_v38  ;;  %v1212_v30 = vperm.slane %v1204_v25, %v2097_v38 }
 0x34e   : > { %v1190_v31 = vsel %vm528_vm1, %v1189_v22, %v1172_v9  ;;  %v1202_v12 = vsel %vm528_vm1, %v1201_v24, %v1176_v14  ;;  %v1670_v9 = vld [vmem:[%s2365_s3] sm:$0xff]  ;;  %v1923_v24 = vmov 32.0  }
 0x34f   : > { %v1196_v32 = vperm.slane %v1190_v31, %v2097_v38  ;;  %v1208_v33 = vperm.slane %v1202_v12, %v2097_v38  ;;  %v1215_v34 = vrot.slane %v1200_v29, 4  ;;  %v1219_v35 = vrot.slane %v1212_v30, 4 }
 0x350   : > { %1791 = vrcp.f32 %v1923_v24 }
 0x351   : > { %v1213_v36 = vrot.slane %v1196_v32, 4  ;;  %v1216_v37 = vsel %vm528_vm1, 0.0, %v1215_v34  ;;  %v1217_v39 = vrot.slane %v1208_v33, 4  ;;  %v1220_v40 = vsel %vm528_vm1, 0.0, %v1219_v35 }
 0x352   : > { %v1226_v41 = vrot.slane %v1216_v37, 4  ;;  %v1237_v42 = vrot.slane %v1220_v40, 4  ;;  %v1221_v43 = vsel %vm528_vm1, %v1215_v34, %v1196_v32  ;;  %v1232_v44 = vsel %vm528_vm1, %v1219_v35, %v1208_v33  ;;  %v1677_v37 = vld [vmem:[%s2369_s7 + $0x18] sm:$0xff] }
 0x353   : > { %v1214_v45 = vsel %vm528_vm1, 0.0, %v1213_v36  ;;  %v1218_v46 = vsel %vm528_vm1, 0.0, %v1217_v39  ;;  %v1225_v48 = vperm.slane %v1221_v43, %v2090_v27  ;;  %v1236_v50 = vperm.slane %v1232_v44, %v2090_v27  ;;  %v1672_v36 = vld [vmem:[#allocation4] sm:$0xff]  ;;  %1452 = vmatpush.bf16.msrb.mxu0 %v1677_v37  ;;  %v1675_v43 = vld [vmem:[%s2369_s7 + $0x8] sm:$0xff] }
 0x354   : > { %v1227_v51 = vsel %vm528_vm1, %v1226_v41, %v1214_v45  ;;  %v1238_v52 = vsel %vm528_vm1, %v1237_v42, %v1218_v46  ;;  %v1676_v41 = vld [vmem:[%s2369_s7 + $0x10] sm:$0xff] }
 0x355   : > { %v1231_v53 = vperm.slane %v1227_v51, %v2090_v27  ;;  %v1242_v54 = vperm.slane %v1238_v52, %v2090_v27  ;;  %v1245_v55 = vrot.slane %v1225_v48, 4  ;;  %v1257_v49 = vrot.slane %v1236_v50, 4  ;;  %v1769_v52 = vld [vmem:[%s2371_s9] ss:$0 sm:$0xff] }
 0x356   : > { %v1792_v25 = vpop.eup %1791 }
 0x357   : > { %v1246_v56 = vsel %vm528_vm1, %v1231_v53, %v1245_v55  ;;  %v1258_v57 = vsel %vm528_vm1, %v1242_v54, %v1257_v49  ;;  %v1243_v58 = vrot.slane %v1231_v53, 4  ;;  %v1255_v59 = vrot.slane %v1242_v54, 4  ;;  %1453 = vmatpush.bf16.msrb.mxu0 %v1676_v41  ;;  %v1770_v54 = vld [vmem:[%s2372_s10] ss:$0 sm:$0xff] }
 0x358   : > { %v1254_v60 = vperm.slane %v1246_v56, %v2097_v38  ;;  %v1266_v47 = vperm.slane %v1258_v57, %v2097_v38  ;;  %v1334_v26 = vmul.f32 32.0, %v1792_v25  ;;  %vm1338_vm7 = vweird.f32 %v1792_v25 }
 0x359   : > { %v1244_v61 = vsel %vm528_vm1, %v1243_v58, %v1225_v48  ;;  %v1256_v62 = vsel %vm528_vm1, %v1255_v59, %v1236_v50  ;;  %v1674_v58 = vld [vmem:[%s2369_s7] sm:$0xff] }
 0x35a   : > { %v1273_v63 = vrot.slane %v1254_v60, 4  ;;  %v1271_v0 = vrot.slane %v1266_v47, 4  ;;  %v1250_v27 = vperm.slane %v1244_v61, %v2097_v38  ;;  %v1262_v1 = vperm.slane %v1256_v62, %v2097_v38  ;;  %v1671_v38 = vld [vmem:[%s2365_s3 + $0x8] sm:$0xff]  ;;  %v1771_v59 = vld [vmem:[%s2368_s6] ss:$0 sm:$0xff] }
 0x35b   : > { %1322 = vmatpush.bf16.msra.mxu2 %v1671_v38  ;;  %v1335_v28 = vsub.f32 1.0, %v1334_v26  ;;  %1454 = vmatpush.bf16.msrb.mxu0 %v1675_v43 }
 0x35c   : > { %v1274_v2 = vsel %vm528_vm1, %v1266_v47, %v1273_v63  ;;  %v1272_v4 = vsel %vm528_vm1, %v1271_v0, %v1254_v60  ;;  %v1267_v5 = vrot.slane %v1262_v1, 4  ;;  %v1269_v6 = vrot.slane %v1250_v27, 4  ;;  %v1772_v0 = vld [vmem:[%s2370_s8] ss:$0 sm:$0xff] }
 0x35d   : > { %1284 = vrot.lane.b32.xlu2 %v1274_v2, %s1920_s25  ;;  %1280 = vrot.lane.b32.xlu1 %v1272_v4, %s1921_s16  ;;  %v1336_v29 = vmul.f32 %v1792_v25, %v1335_v28  ;;  %s1599_s25 = sshll.u32 %s460_s23, 3  ;;  %s1663_s16 = sshll.u32 %s1901_s28, 3 }
 0x35e   : > { %v1270_v7 = vsel %vm528_vm1, %v1262_v1, %v1269_v6  ;;  %v1268_v8 = vsel %vm528_vm1, %v1267_v5, %v1250_v27  ;;  %s1507_s27 = scalar_lea.hbm %s2375_s13, %s1663_s16  ;;  %s462_s14 = scalar_lea.vmem [#allocation7], %s1599_s25 }
 0x35f   : > { %1276 = vrot.lane.b32.xlu0 %v1270_v7, %s1922_s24  ;;  %1323 = vmatpush.bf16.msra.mxu2 %v1670_v9  ;;  %v1337_v30 = vadd.f32 %v1792_v25, %v1336_v29  ;;  %s1509_s28 = sshll.u32 %s462_s14, 4  ;;  %s1511_s17 = sshll.u32 %s1507_s27, 4  ;;  %s1510_s28 = int_to_ptr.vmem [resolvable:$true] %s1509_s28  ;;  %s1512_s17 = int_to_ptr.hbm [resolvable:$true] %s1511_s17 }
 0x360   : > { %1455 = vmatpush.bf16.msrb.mxu0 %v1674_v58  ;;  %s1841_s24 = sshra.s32 %s1512_s17, 4  ;;  %s1847_s25 = scalar_lea.hbm %s2375_s13, 16  ;;  %s1842_s24 = int_to_ptr.hbm [resolvable:$true] %s1841_s24 }
 0x361   : > { %v1339_v31 = vsel %vm1338_vm7, %v1792_v25, %v1337_v30  ;;  %s1843_s16 = scalar_lea.hbm %s1842_s24, 8  ;;  %p1848_p5 = scmp.lt.s32.totalorder %s1842_s24, %s2375_s13 }
 0x362   : > { %p1844_p1 = scmp.ne.s32.totalorder %s1842_s24, %s1843_s16  ;;  %p1849_p6 = scmp.lt.s32.totalorder %s1847_s25, %s1843_s16 }
 0x364   : > { %p1845_p2 = pnand %p1844_p1, %p2034_p4  ;;  %p1850_p7 = por %p1849_p6, %p1848_p5 }
 0x366   : > { %p1846_p3 = pneg %p1845_p2 }
 0x368   : > { %p1851_p9 = pnand %p1850_p7, %p1846_p3 }
 0x3b7   : > { %v1285_v14 = vpop.permute.xlu2 %1284 }
 0x3cf   : > { %v1281_v11 = vpop.permute.xlu1 %1280 }
 0x3d1   : > { %v1277_v10 = vpop.permute.xlu0 %1276 }
 0x3d2   : > { %v1287_v13 = vsel %vm959_vm3, %v1268_v8, %v1277_v10 }
 0x3d3   : > { %v1289_v15 = vsel %vm1288_vm5, %v1287_v13, %v1281_v11 }
 0x3d4   : > { %v1291_v16 = vsel %vm1290_vm6, %v1289_v15, %v1285_v14 }
 0x3d5   : > { %v1292_v17 = vpack.c.bf16 %v1291_v16, %v1291_v16 }
 0x3d7   : > { %1635 = vmatmul.msk.bf16.vlgmr.msra.gmra.mxu2 %vm500_vm0, %v1292_v17 }
 0x45a   : > { %v1325_v19 = vpop.f32.mrf.mxu2 }
 0x45b   : > { %v1326_v20 = vadd.f32 %v1768_v18, %v1325_v19 }
 0x45d   : > { %v1329_v21 = vadd.f32 %v1326_v20, %v2066_v3  ;;  %v1673_v3 = vld [vmem:[#allocation4 + $0x8] sm:$0xff]  ;;  %v1773_v20 = vld [vmem:[%s2373_s11] ss:$0 sm:$0xff] }
 0x45e   : > { %1399 = vmatpush.bf16.msra.mxu3 %v1673_v3 }
 0x45f   : > { %v1330_v22 = vsel %vm500_vm0, %v1329_v21, 0.0 }
 0x460   : > { %1331 = vadd.xlane.f32.xlu0 %v1330_v22 }
 0x462   : > { %v1327_v23 = vpop.f32.mrf.mxu2  ;;  %1400 = vmatpush.bf16.msra.mxu3 %v1672_v36 }
 0x463   : > { %v1774_v23 = vld [vmem:[%s2374_s12] ss:$0 sm:$0xff] }
 0x4d3   : > { %v1332_v12 = vpop.xlane.xlu0 %1331 }
 0x4d4   : > { %v1340_v32 = vmul.f32 %v1339_v31, %v1332_v12 }
 0x4d6   : > { %v1341_v33 = vsub.f32 %v1329_v21, %v1340_v32 }
 0x4d8   : > { %v1342_v34 = vmul.f32 %v1341_v33, %v1341_v33 }
 0x4da   : > { %v1343_v35 = vsel %vm500_vm0, %v1342_v34, 0.0 }
 0x4db   : > { %1344 = vadd.xlane.f32.xlu1 %v1343_v35 }
 0x54e   : > { %v1345_v39 = vpop.xlane.xlu1 %1344 }
 0x54f   : > { %v1346_v40 = vmul.f32 %v1345_v39, %v1339_v31 }
 0x551   : > { %v1347_v42 = vadd.f32 1e-05, %v1346_v40 }
 0x553   : > { %1793 = vrsqrt.f32 %v1347_v42  ;;  %vm1354_vm9 = vweird.f32 %v1347_v42 }
 0x559   : > { %v1794_v44 = vpop.eup %1793 }
 0x55a   : > { %v1349_v45 = vmul.f32 %v1794_v44, %v1347_v42  ;;  %vm1355_vm8 = vweird.f32 %v1794_v44 }
 0x55b   : > { %vm1356_vm10 = vmor %vm1354_vm9, %vm1355_vm8 }
 0x55c   : > { %v1350_v46 = vmul.f32 %v1794_v44, %v1349_v45 }
 0x55e   : > { %v1351_v48 = vmul.f32 0.5, %v1350_v46 }
 0x560   : > { %v1352_v50 = vsub.f32 1.5, %v1351_v48 }
 0x562   : > { %v1353_v51 = vmul.f32 %v1794_v44, %v1352_v50 }
 0x564   : > { %v1357_v53 = vsel %vm1356_vm10, %v1794_v44, %v1353_v51 }
 0x565   : > { %v1358_v55 = vmul.f32 %v1357_v53, %v1341_v33 }
 0x567   : > { %v1363_v49 = vmul.f32 %v1769_v52, %v1358_v55 }
 0x569   : > { %v1368_v56 = vadd.f32 %v1770_v54, %v1363_v49 }
 0x56b   : > { %v1369_v57 = vpack.c.bf16 %v1368_v56, %v1368_v56 }
 0x56d   : > { %1644 = vmatmul.msk.bf16.vlgmr.msra.gmra.mxu3 %vm500_vm0, %v1369_v57 }
 0x5f0   : > { %v1402_v60 = vpop.f32.mrf.mxu3 }
 0x5f1   : > { %v1403_v47 = vadd.f32 %v1771_v59, %v1402_v60 }
 0x5f3   : > { %v1406_v61 = vmax.f32 %v1403_v47, 0.0 }
 0x5f5   : > { %v1407_v62 = vpack.c.bf16 %v1406_v61, %v1406_v61 }
 0x5f7   : > { %1661 = vmatmul.msk.bf16.vlgmr.msrb.gmra.mxu0 %vm1444_vm11, %v1407_v62 }
 0x5f8   : > { %v1404_v63 = vpop.f32.mrf.mxu3 }
 0x674   : > { %v1457_v27 = vpop.f32.mrf.mxu0 }
 0x675   : > { %v1458_v1 = vadd.f32 %v1772_v0, %v1457_v27 }
 0x677   : > { %v1461_v2 = vadd.f32 %v1458_v1, %v1368_v56 }
 0x679   : > { %v1462_v4 = vsel %vm500_vm0, %v1461_v2, 0.0 }
 0x67a   : > { %1463 = vadd.xlane.f32.xlu2 %v1462_v4 }
 0x67c   : > { %v1459_v5 = vpop.f32.mrf.mxu0 }
 0x6ed   : > { %v1464_v6 = vpop.xlane.xlu2 %1463 }
 0x6ee   : > { %v1465_v7 = vmul.f32 %v1464_v6, %v1339_v31 }
 0x6f0   : > { %v1466_v8 = vsub.f32 %v1461_v2, %v1465_v7 }
 0x6f2   : > { %v1467_v38 = vmul.f32 %v1466_v8, %v1466_v8 }
 0x6f4   : > { %v1468_v9 = vsel %vm500_vm0, %v1467_v38, 0.0 }
 0x6f5   : > { %1469 = vadd.xlane.f32.xlu0 %v1468_v9 }
 0x768   : > { %v1470_v10 = vpop.xlane.xlu0 %1469 }
 0x769   : > { %v1471_v11 = vmul.f32 %v1470_v10, %v1339_v31 }
 0x76b   : > { %v1472_v13 = vadd.f32 1e-05, %v1471_v11 }
 0x76d   : > { %1795 = vrsqrt.f32 %v1472_v13  ;;  %vm1479_vm13 = vweird.f32 %v1472_v13 }
 0x773   : > { %v1796_v14 = vpop.eup %1795 }
 0x774   : > { %v1474_v15 = vmul.f32 %v1796_v14, %v1472_v13  ;;  %vm1480_vm12 = vweird.f32 %v1796_v14 }
 0x775   : > { %vm1481_vm14 = vmor %vm1479_vm13, %vm1480_vm12 }
 0x776   : > { %v1475_v16 = vmul.f32 %v1796_v14, %v1474_v15 }
 0x778   : > { %v1476_v17 = vmul.f32 0.5, %v1475_v16 }
 0x77a   : > { %v1477_v18 = vsub.f32 1.5, %v1476_v17 }
 0x77c   : > { %v1478_v19 = vmul.f32 %v1796_v14, %v1477_v18 }
 0x77e   : > { %v1482_v21 = vsel %vm1481_vm14, %v1796_v14, %v1478_v19 }
 0x77f   : > { %v1483_v22 = vmul.f32 %v1482_v21, %v1466_v8 }
 0x781   : > { %v1488_v24 = vmul.f32 %v1773_v20, %v1483_v22 }
 0x783   : > { %v1493_v25 = vadd.f32 %v1774_v23, %v1488_v24 }
 0x785   : > { %1494 = vst.msk [vmem:[%s462_s14] sm:$0xff] %vm500_vm0, %v1493_v25 }
 0x786   : > { %1854 = shalt.err (!%p1851_p9)
}
 0x787   : > { %1682 = dma.vmem_to_hbm [thread:$0]  (%p2034_p4), %s1510_s28, 128, %s1512_s17, %s1496_s22  }
 0x788 PF: > { %s2389_s23 = sld [smem:[#allocation10_spill]]  ;;  %p1694_p10 = scmp.ge.s32.totalorder %s1909_s30, 2 }
 0x78a   : > { %p1689_p11 = pnand %p1694_p10, %p2041_p8 }
 0x78c   : > { %p1690_p12 = pneg %p1689_p11 }
 0x78e   : > { %s1523_s21 = sand.u32 1, %s2389_s23  }
 0x78f   : > { %s1524_s19 = scalar_lea.sflag [#allocation6], %s1523_s21 }
 0x790   : > { %1884 = dma.done.wait (%p1690_p12), %s1524_s19, 128  }
 0x791   : > { %1886 = vsyncadd (%p1690_p12), %s1524_s19, 4294967168  ;;  %s27_s30 = sadd.s32 1, %s1909_s30   ;;  %s2390_s14 = sld [smem:[#allocation11_spill]] }
 0x792   : > { %p24_p13 = scmp.ge.s32.totalorder %s27_s30, 4   ;;  %s2391_s27 = sld [smem:[#allocation14_spill]] }
 0x793   : > { %s2392_s28 = sld [smem:[#allocation12_spill]]  ;;  %s2394_s25 = smov %s1893_s26 }
 0x794   : > { %s2393_s29 = sld [smem:[#allocation13_spill]]  ;;  %26 = sbr.rel (!%p24_p13) target bundleno = 7 (0x7), region = 116 }
 0x797   : > { %s2395_s26 = smov %s2390_s14 }
 0x799   :  { %1530 = vsyncpa [#allocation5], 1 }
 0x79a   :  { %1532 = vsyncpa [#allocation5 + $0x1], 1 }
 0x79b   :  { %1533 = vsyncpa [#allocation6], 1 }
 0x79c   :  { %1535 = vsyncpa [#allocation6 + $0x1], 1 }

// kernel: tpu_custom_call.1
= control target key start
LH: loop header
LB: loop body
LE: loop exit
PB: predicated region body
PF: predicated region fallthrough
CT: control target
= control target key end

     0   :  { %s2362_s0 = inlined_call_operand.vmem [shape: f32[2,8,32], index: 0, kind: input, shape index: {}]   ;;  %s2363_s1 = inlined_call_operand.vmem [shape: bf16[32,96], index: 1, kind: input, shape index: {}]   ;;  %s2364_s2 = inlined_call_operand.vmem [shape: f32[1,96], index: 2, kind: input, shape index: {}]   ;;  %s2365_s3 = inlined_call_operand.vmem [shape: bf16[32,32], index: 3, kind: input, shape index: {}]   ;;  %s2366_s4 = inlined_call_operand.vmem [shape: f32[1,32], index: 4, kind: input, shape index: {}]   ;;  %s2367_s5 = inlined_call_operand.hbm [shape: bf16[32,64], index: 5, kind: input, shape index: {}]   ;;  %s2368_s6 = inlined_call_operand.vmem [shape: f32[1,64], index: 6, kind: input, shape index: {}]   ;;  %s2369_s7 = inlined_call_operand.vmem [shape: bf16[64,32], index: 7, kind: input, shape index: {}]   ;;  %s2370_s8 = inlined_call_operand.vmem [shape: f32[1,32], index: 8, kind: input, shape index: {}]   ;;  %s2371_s9 = inlined_call_operand.vmem [shape: f32[1,32], index: 9, kind: input, shape index: {}]   ;;  %s2372_s10 = inlined_call_operand.vmem [shape: f32[1,32], index: 10, kind: input, shape index: {}]   ;;  %s2373_s11 = inlined_call_operand.vmem [shape: f32[1,32], index: 11, kind: input, shape index: {}]   ;;  %s2374_s12 = inlined_call_operand.vmem [shape: f32[1,32], index: 12, kind: input, shape index: {}]   ;;  %s2375_s13 = inlined_call_operand.hbm [shape: f32[2,8,32], index: 13, kind: output, shape index: {}]  }
   0x1   :  { %2380 = sst [smem:[#allocation15_spill]] %s2367_s5 }
   0x2   :  { %18 = vsyncpa [#allocation5], 0 }
   0x3   :  { %19 = vsyncpa [#allocation6], 0 }
   0x4   :  { %21 = vsyncpa [#allocation6 + $0x1], 0  ;;  %s1994_s25 = smov 0   ;;  %s1996_s26 = smov 0  }
   0x5   :  { %s1998_s27 = smov 0   ;;  %s2000_s28 = smov 0  }
   0x6   :  { %s2002_s29 = smov 0   ;;  %s2004_s30 = smov 0  }
   0x7 LB: > { %2381 = sst [smem:[#allocation10_spill]] %s1889_s25  ;;  %s1592_s14 = sadd.s32 4294967295, %s1909_s30   ;;  %s1909_s30 = sphi %s2004_s30, %s27_s30   ;;  %s1905_s29 = sphi %s2002_s29, %s2393_s29   ;;  %s1901_s28 = sphi %s2000_s28, %s2392_s28   ;;  %s1897_s27 = sphi %s1998_s27, %s2391_s27   ;;  %s1893_s26 = sphi %s1996_s26, %s2395_s26   ;;  %s1889_s25 = sphi %s1994_s25, %s2394_s25  }
   0x8   : > { %2382 = sst [smem:[#allocation11_spill]] %s1897_s27  ;;  %s1593_s15 = sadd.s32 4294967294, %s1909_s30  }
   0x9   : > { %2383 = sst [smem:[#allocation12_spill]] %s1905_s29  ;;  %s39_s16 = sadd.s32 1, %s1905_s29 }
   0xa   : > { %s326_s17 = sadd.s32 1, %s1897_s27  ;;  %p41_p0 = scmp.ge.s32.totalorder %s39_s16, 2 }
   0xb   : > { %p336_p1 = scmp.ne.s32.totalorder %s1897_s27, %s1893_s26  ;;  %p337_p2 = scmp.eq.s32.totalorder %s1592_s14, 1 }
   0xc   : > { %p342_p3 = scmp.ne.s32.totalorder %s1893_s26, %s1889_s25  ;;  %s2397_s16 = smov (%p41_p0, %s39_s16), 0 }
   0xd   : > { %2384 = sst [smem:[#allocation13_spill]] %s2397_s16  ;;  %p2034_p4 = por %p337_p2, %p336_p1 }
   0xe   : > { %p343_p5 = scmp.eq.s32.totalorder %s1593_s15, 1  ;;  %s321_s19 = ssub.s32 %s1905_s29, %s2397_s16 }
   0xf   : > { %p1594_p6 = scmp.ge.s32.totalorder %s1909_s30, 1  ;;  %p324_p7 = scmp.eq.s32.totalorder %s321_s19, 0 }
  0x10   : > { %p2041_p8 = por %p343_p5, %p342_p3  ;;  %p350_p9 = scmp.lt.s32.totalorder %s1909_s30, 3 }
  0x11   : > { %s2047_s21 = scalar_select %p324_p7, %s1897_s27, %s326_s17  }
  0x12   : > { %p351_p10 = pnand %p1594_p6, %p350_p9  ;;  %p1692_p11 = scmp.eq.s32.totalorder %s1592_s14, 0 }
  0x13   : > { %2387 = sst [smem:[#allocation14_spill]] %s2047_s21  ;;  %s1911_s25 = smov [#allocation4]  }
  0x14   : > { %s2388_s5 = sld [smem:[#allocation15_spill]]  ;;  %p1684_p12 = pneg %p351_p10 }
  0x15   : > { %s375_s15 = sshll.u32 %s1911_s25, 4  ;;  %s1912_s19 = smov 64   ;;  %s376_s15 = int_to_ptr.vmem [resolvable:$true] %s375_s15 }
  0x16   : > { %p1685_p13 = pnand %p1692_p11, %p1684_p12  ;;  %s1913_s16 = smov 4  }
  0x17   : > { %419 = sbr.rel (%p351_p10) target bundleno = 1928 (0x788), region = 72 }
  0x1a   : > { %s373_s24 = sshll.u32 %s2388_s5, 4  ;;  %s374_s24 = int_to_ptr.hbm [resolvable:$true] %s373_s24 }
  0x1b   : > { %1687 = dma.hbm_to_vmem [thread:$0]  (!%p1685_p13), %s374_s24, 256, %s376_s15, [#allocation5], %s1912_s19, %s1912_s19, %s1913_s16  }
  0x1c   : > { %1880 = dma.done.wait (%p1692_p11), [#allocation5], 256  }
  0x1d   : > { %1882 = vsyncadd (%p1692_p11), [#allocation5], 4294967040  ;;  %p463_p0 = scmp.lt.s32.totalorder %s1901_s28, 1  ;;  %v1667_v0 = vld [vmem:[%s2363_s1 + $0x8] sm:$0xff]  ;;  %v1668_v2 = vld [vmem:[%s2363_s1] sm:$0xff]  ;;  %s1914_s15 = smov 96  }
  0x1e   : > { %v1669_v1 = vld [vmem:[%s2363_s1 + $0x8] sm:$0xff]  ;;  %493 = vrot.lane.b32.xlu0 %v1667_v0, %s1914_s15  ;;  %v1666_v5 = vld [vmem:[%s2363_s1] sm:$0xff]  ;;  %vm500_vm0 = vcmask 261120   ;;  %s1916_s22 = smov 112   ;;  %v1918_v21 = vmov 1983009808  }
  0x1f   : > { %s464_s14 = scalar_select %p463_p0, %s1901_s28, 1  ;;  %822 = vmatpush.bf16.msra.mxu1 %v1669_v1  ;;  %v1766_v6 = vld [vmem:[%s2364_s2] ss:$0 sm:$0xff]  ;;  %v533_v22 = vunpack.c.l.s4 %v1918_v21  ;;  %vm528_vm1 = vcmask 1047556   ;;  %v1919_v31 = vmov 1934713408  }
  0x20   : > { %497 = vrot.lane.b32.xlu1 %v1766_v6, %s1914_s15  ;;  %v1767_v9 = vld [vmem:[%s2364_s2] ss:$0 sm:$0xff]  ;;  %v557_v32 = vunpack.c.l.s4 %v1919_v31  ;;  %vm725_vm2 = vcmask 60416   ;;  %vm959_vm3 = vcmask 64512   ;;  %vm1083_vm4 = vcmask 1043456   ;;  %s1920_s25 = smov 24  }
  0x21   : > { %s1600_s17 = sshll.u32 %s464_s14, 3  ;;  %v2090_v27 = vunpack.c.0.s8 %v533_v22  ;;  %s1921_s16 = smov 16   ;;  %vm1288_vm5 = vcmask 130048   ;;  %vm1290_vm6 = vcmask 195584   ;;  %vm1444_vm11 = vcmask 523264  }
  0x22   : > { %s466_s23 = scalar_lea.vmem %s2362_s0, %s1600_s17  ;;  %s1915_s17 = smov 120   ;;  %v2097_v38 = vunpack.c.0.s8 %v557_v32 }
  0x23   : > { %v2066_v3 = vld [vmem:[%s466_s23] sm:$0xff]  ;;  %823 = vmatpush.bf16.msra.mxu1 %v1668_v2  ;;  %s1917_s23 = smov 104   ;;  %s1922_s24 = smov 8  }
  0x24   : > { %v791_v4 = vpack.c.bf16 %v2066_v3, %v2066_v3 }
  0x26   : > { %1618 = vmatmul.msk.bf16.vlgmr.msra.gmra.mxu1 %vm500_vm0, %v791_v4  ;;  %491 = vrot.lane.b32.xlu0 %v1666_v5, %s1914_s15 }
  0x90   : > { %v494_v7 = vpop.permute.xlu0 %493 }
  0x91   : > { %510 = vmatpush.bf16.msra.mxu0 %v494_v7 }
  0x92   : > { %v498_v14 = vpop.permute.xlu1 %497 }
  0x98   : > { %v492_v8 = vpop.permute.xlu0 %491 }
  0x99   : > { %511 = vmatpush.bf16.msra.mxu0 %v492_v8 }
  0x9c   : > { %1609 = vmatmul.msk.bf16.vlgmr.msra.gmra.mxu0 %vm500_vm0, %v791_v4 }
  0xa3   : > { %v825_v10 = vpop.f32.mrf.mxu1 }
  0xa4   : > { %v826_v11 = vadd.f32 %v1767_v9, %v825_v10 }
  0xa6   : > { %v2084_v12 = vmul.f32 0.35355338, %v826_v11 }
  0xa8   : > { %831 = vrot.lane.b32.xlu0 %v2084_v12, %s1915_s17  ;;  %v843_v63 = vrot.slane %v2084_v12, 4 }
  0xab   : > { %v827_v13 = vpop.f32.mrf.mxu1 }
 0x119   : > { %v513_v15 = vpop.f32.mrf.mxu0 }
 0x11a   : > { %v514_v16 = vadd.f32 %v513_v15, %v498_v14  ;;  %v832_v24 = vpop.permute.xlu0 %831 }
 0x11b   : > { %v855_v30 = vrot.slane %v832_v24, 4 }
 0x11c   : > { %521 = vrot.lane.b32.xlu2 %v514_v16, %s1916_s22  ;;  %518 = vrot.lane.b32.xlu1 %v514_v16, %s1915_s17  ;;  %v530_v25 = vrot.slane %v514_v16, 4 }
 0x121   : > { %v515_v17 = vpop.f32.mrf.mxu0 }
 0x124   : > { %524 = vrot.lane.b32.xlu2 %v514_v16, %s1917_s23  ;;  %834 = vrot.lane.b32.xlu1 %v2084_v12, %s1916_s22 }
 0x12c   : > { %837 = vrot.lane.b32.xlu2 %v2084_v12, %s1917_s23  ;;  %s460_s23 = sand.u32 1, %s1893_s26  }
 0x12d   : > { %s1496_s22 = scalar_lea.sflag [#allocation6], %s460_s23 }
 0x176   : > { %v522_v18 = vpop.permute.xlu2 %521 }
 0x177   : > { %v527_v23 = vrot.slane %v522_v18, 4  ;;  %v531_v29 = vsel %vm528_vm1, %v522_v18, %v530_v25 }
 0x178   : > { %v539_v35 = vperm.slane %v531_v29, %v2090_v27 }
 0x179   : > { %v529_v28 = vsel %vm528_vm1, %v527_v23, %v514_v16 }
 0x17a   : > { %v535_v34 = vperm.slane %v529_v28, %v2090_v27  ;;  %v566_v46 = vrot.slane %v539_v35, 4 }
 0x17c   : > { %v554_v44 = vrot.slane %v535_v34, 4 }
 0x17e   : > { %v525_v19 = vpop.permute.xlu2 %524 }
 0x17f   : > { %v1761_v20 = vpack.i.bf16 %v525_v19, %v522_v18  ;;  %v540_v36 = vrot.slane %v525_v19, 4 }
 0x181   : > { %1762 = vrot.lane.b32.xlu1 %v1761_v20, %s1914_s15 }
 0x186   : > { %v838_v26 = vpop.permute.xlu2 %837 }
 0x187   : > { %v853_v33 = vrot.slane %v838_v26, 4  ;;  %v856_v37 = vsel %vm528_vm1, %v838_v26, %v855_v30 }
 0x188   : > { %v2103_v47 = vperm.slane %v856_v37, %v2090_v27 }
 0x189   : > { %v854_v40 = vsel %vm528_vm1, %v853_v33, %v832_v24 }
 0x18a   : > { %v860_v49 = vperm.slane %v854_v40, %v2090_v27  ;;  %v877_v61 = vrot.slane %v2103_v47, 4 }
 0x18c   : > { %v865_v60 = vrot.slane %v860_v49, 4 }
 0x18e   : > { %v519_v39 = vpop.permute.xlu1 %518 }
 0x18f   : > { %v541_v41 = vsel %vm528_vm1, %v540_v36, %v519_v39  ;;  %v542_v42 = vrot.slane %v519_v39, 4  ;;  %v1756_v43 = vpack.i.bf16 %v519_v39, %v514_v16 }
 0x190   : > { %v547_v45 = vperm.slane %v541_v41, %v2090_v27 }
 0x191   : > { %v543_v48 = vsel %vm528_vm1, %v525_v19, %v542_v42  ;;  %1757 = vrot.lane.b32.xlu0 %v1756_v43, %s1914_s15 }
 0x192   : > { %v551_v50 = vperm.slane %v543_v48, %v2090_v27  ;;  %v552_v51 = vrot.slane %v547_v45, 4  ;;  %v555_v52 = vsel %vm528_vm1, %v547_v45, %v554_v44 }
 0x193   : > { %v563_v53 = vperm.slane %v555_v52, %v2097_v38 }
 0x194   : > { %v553_v54 = vsel %vm528_vm1, %v552_v51, %v535_v34  ;;  %v564_v55 = vrot.slane %v551_v50, 4  ;;  %v567_v56 = vsel %vm528_vm1, %v551_v50, %v566_v46 }
 0x195   : > { %v559_v57 = vperm.slane %v553_v54, %v2097_v38  ;;  %v578_v58 = vrot.slane %v563_v53, 4  ;;  %v575_v59 = vperm.slane %v567_v56, %v2097_v38  ;;  %v586_v4 = vpack.c.bf16 %v563_v53, %v563_v53 }
 0x196   : > { %v565_v62 = vsel %vm528_vm1, %v564_v55, %v539_v35  ;;  %v835_v0 = vpop.permute.xlu1 %834 }
 0x197   : > { %v576_v1 = vrot.slane %v559_v57, 4  ;;  %v579_v2 = vsel %vm528_vm1, 0.0, %v578_v58  ;;  %v571_v5 = vperm.slane %v565_v62, %v2097_v38  ;;  %v584_v6 = vpack.c.bf16 %v559_v57, %v559_v57 }
 0x198   : > { %v582_v7 = vrot.slane %v575_v59, 4  ;;  %v590_v8 = vpack.c.bf16 %v575_v59, %v575_v59  ;;  %v840_v9 = vrot.slane %v835_v0, 4  ;;  %v844_v14 = vsel %vm528_vm1, %v835_v0, %v843_v63 }
 0x199   : > { %v577_v10 = vsel %vm528_vm1, 0.0, %v576_v1  ;;  %v580_v11 = vrot.slane %v571_v5, 4  ;;  %v588_v13 = vpack.c.bf16 %v571_v5, %v571_v5  ;;  %v587_v15 = vpack.c.bf16 %v579_v2, %v579_v2 }
 0x19a   : > { %v583_v16 = vsel %vm528_vm1, 0.0, %v582_v7  ;;  %v675_v17 = vrot.slane %v590_v8, 4  ;;  %v842_v18 = vsel %vm528_vm1, %v840_v9, %v2084_v12  ;;  %v585_v23 = vpack.c.bf16 %v577_v10, %v577_v10 }
 0x19b   : > { %v581_v19 = vsel %vm528_vm1, 0.0, %v580_v11  ;;  %v591_v20 = vpack.c.bf16 %v583_v16, %v583_v16  ;;  %v668_v21 = vrot.slane %v588_v13, 4  ;;  %v848_v22 = vperm.slane %v842_v18, %v2090_v27 }
 0x19c   : > { %v589_v24 = vpack.c.bf16 %v581_v19, %v581_v19  ;;  %v676_v25 = vsel %vm528_vm1, %v675_v17, %v586_v4  ;;  %v852_v26 = vperm.slane %v844_v14, %v2090_v27 }
 0x19d   : > { %v670_v28 = vsel %vm528_vm1, %v668_v21, %v584_v6  ;;  %v680_v29 = vperm.slane %v676_v25, %v2090_v27  ;;  %v695_v30 = vrot.slane %v591_v20, 4  ;;  %v866_v31 = vsel %vm528_vm1, %v865_v60, %v848_v22 }
 0x19e   : > { %v674_v12 = vperm.slane %v670_v28, %v2090_v27  ;;  %v689_v32 = vrot.slane %v589_v24, 4  ;;  %v867_v33 = vrot.slane %v848_v22, 4  ;;  %v872_v34 = vperm.slane %v866_v31, %v2097_v38 }
 0x19f   : > { %v681_v35 = vrot.slane %v680_v29, 4  ;;  %v696_v36 = vsel %vm528_vm1, %v695_v30, %v587_v15  ;;  %v878_v37 = vsel %vm528_vm1, %v877_v61, %v852_v26  ;;  %v879_v39 = vrot.slane %v852_v26, 4 }
 0x1a0   : > { %v690_v40 = vsel %vm528_vm1, %v689_v32, %v585_v23  ;;  %v700_v41 = vperm.slane %v696_v36, %v2090_v27  ;;  %v868_v42 = vsel %vm528_vm1, %v860_v49, %v867_v33  ;;  %v884_v43 = vperm.slane %v878_v37, %v2097_v38 }
 0x1a1   : > { %v682_v44 = vsel %vm528_vm1, %v681_v35, %v674_v12  ;;  %v694_v45 = vperm.slane %v690_v40, %v2090_v27  ;;  %v876_v46 = vperm.slane %v868_v42, %v2097_v38  ;;  %v880_v48 = vsel %vm528_vm1, %v2103_v47, %v879_v39 }
 0x1a2   : > { %v686_v50 = vperm.slane %v682_v44, %v2097_v38  ;;  %v701_v51 = vrot.slane %v700_v41, 4  ;;  %v888_v52 = vperm.slane %v880_v48, %v2097_v38  ;;  %v889_v53 = vrot.slane %v872_v34, 4 }
 0x1a3   : > { %v891_v54 = vrot.slane %v876_v46, 4  ;;  %v893_v55 = vrot.slane %v884_v43, 4 }
 0x1a4   : > { %v687_v49 = vrot.slane %v686_v50, 4  ;;  %v702_v56 = vsel %vm528_vm1, %v701_v51, %v694_v45  ;;  %v713_v57 = vshrl.u32 %v686_v50, 16  ;;  %v890_v59 = vsel %vm528_vm1, 0.0, %v889_v53 }
 0x1a5   : > { %v706_v58 = vperm.slane %v702_v56, %v2097_v38  ;;  %v892_v60 = vsel %vm528_vm1, 0.0, %v891_v54  ;;  %v895_v47 = vrot.slane %v888_v52, 4  ;;  %v894_v62 = vsel %vm528_vm1, 0.0, %v893_v55 }
 0x1a6   : > { %v688_v61 = vsel %vm528_vm1, 0, %v687_v49  ;;  %v902_v63 = vrot.slane %v892_v60, 4  ;;  %v897_v0 = vsel %vm528_vm1, %v891_v54, %v872_v34 }
 0x1a7   : > { %v707_v1 = vrot.slane %v706_v58, 4  ;;  %v711_v2 = vpack.i.b16 %v706_v58, %v686_v50  ;;  %v714_v4 = vshrl.u32 %v706_v58, 16  ;;  %v721_v5 = vshrl.u32 %v688_v61, 16 }
 0x1a8   : > { %v896_v6 = vsel %vm528_vm1, 0.0, %v895_v47  ;;  %v908_v7 = vsel %vm528_vm1, %v895_v47, %v884_v43  ;;  %v901_v8 = vperm.slane %v897_v0, %v2090_v27  ;;  %v903_v9 = vsel %vm528_vm1, %v902_v63, %v890_v59 }
 0x1a9   : > { %v708_v10 = vsel %vm528_vm1, 0, %v707_v1  ;;  %v715_v11 = vpack.i.b16 %v714_v4, %v713_v57  ;;  %726 = vst.msk [vmem:[#allocation2] sm:$0xf] %vm725_vm2, %v711_v2  ;;  %v912_v13 = vperm.slane %v908_v7, %v2090_v27  ;;  %v913_v14 = vrot.slane %v896_v6, 4 }
 0x1aa   : > { %v719_v15 = vpack.i.b16 %v708_v10, %v688_v61  ;;  %v722_v16 = vshrl.u32 %v708_v10, 16  ;;  %v907_v17 = vperm.slane %v903_v9, %v2090_v27  ;;  %v921_v18 = vrot.slane %v901_v8, 4 }
 0x1ab   : > { %727 = vst.msk [vmem:[#allocation2 + $0x4] sm:$0xf] %vm725_vm2, %v715_v11  ;;  %v914_v19 = vsel %vm528_vm1, %v913_v14, %v894_v62  ;;  %v933_v20 = vrot.slane %v912_v13, 4 }
 0x1ac   : > { %v723_v21 = vpack.i.b16 %v722_v16, %v721_v5  ;;  %728 = vst.msk [vmem:[#allocation2 + $0x8] sm:$0xf] %vm725_vm2, %v719_v15  ;;  %v918_v22 = vperm.slane %v914_v19, %v2090_v27  ;;  %v919_v23 = vrot.slane %v907_v17, 4  ;;  %v922_v26 = vsel %vm528_vm1, %v907_v17, %v921_v18 }
 0x1ad   : > { %v930_v34 = vperm.slane %v922_v26, %v2097_v38 }
 0x1ae   : > { %729 = vst.msk [vmem:[#allocation2 + $0xc] sm:$0xf] %vm725_vm2, %v723_v21  ;;  %v920_v24 = vsel %vm528_vm1, %v919_v23, %v901_v8  ;;  %v931_v25 = vrot.slane %v918_v22, 4  ;;  %v934_v28 = vsel %vm528_vm1, %v918_v22, %v933_v20 }
 0x1af   : > { %v926_v29 = vperm.slane %v920_v24, %v2097_v38  ;;  %v942_v30 = vperm.slane %v934_v28, %v2097_v38  ;;  %v949_v45 = vrot.slane %v930_v34, 4 }
 0x1b0   : > { %v955_v31 = vld [vmem:[#allocation2] sm:$0xf]  ;;  %v932_v12 = vsel %vm528_vm1, %v931_v25, %v912_v13 }
 0x1b1   : > { %v964_v32 = vsel %vm959_vm3, %v955_v31, 0  ;;  %v938_v33 = vperm.slane %v932_v12, %v2097_v38  ;;  %v945_v36 = vrot.slane %v926_v29, 4  ;;  %v947_v41 = vrot.slane %v942_v30, 4 }
 0x1b2   : > { %973 = vmatpush.bf16.xpose.msra.mxu2 %v964_v32  ;;  %v956_v35 = vld [vmem:[#allocation2 + $0x4] sm:$0xf]  ;;  %v950_v53 = vsel %vm528_vm1, %v942_v30, %v949_v45 }
 0x1b3   : > { %v983_v37 = vsel %vm959_vm3, %v956_v35, 0  ;;  %v957_v39 = vld [vmem:[#allocation2 + $0x8] sm:$0xf]  ;;  %v943_v40 = vrot.slane %v938_v33, 4  ;;  %v946_v48 = vsel %vm528_vm1, %v938_v33, %v945_v36  ;;  %v948_v51 = vsel %vm528_vm1, %v947_v41, %v930_v34 }
 0x1b4   : > { %992 = vmatpush.bf16.xpose.msra.mxu3 %v983_v37  ;;  %v1002_v42 = vsel %vm959_vm3, %v957_v39, 0  ;;  %v952_v52 = vpack.c.bf16 %v946_v48, %v946_v48  ;;  %v953_v54 = vpack.c.bf16 %v948_v51, %v948_v51  ;;  %v954_v55 = vpack.c.bf16 %v950_v53, %v950_v53 }
 0x1b5   : > { %1011 = vmatpush.bf16.xpose.msrb.mxu0 %v1002_v42  ;;  %v958_v43 = vld [vmem:[#allocation2 + $0xc] sm:$0xf]  ;;  %v944_v44 = vsel %vm528_vm1, %v943_v40, %v926_v29 }
 0x1b6   : > { %v1021_v46 = vsel %vm959_vm3, %v958_v43, 0  ;;  %v951_v50 = vpack.c.bf16 %v944_v44, %v944_v44 }
 0x1b7   : > { %1030 = vmatpush.bf16.xpose.msrb.mxu1 %v1021_v46 }
 0x1b9   : > { %1619 = vmatmul.msk.bf16.vlgmr.msra.gmra.mxu2 %vm959_vm3, %v951_v50 }
 0x1bb   : > { %1620 = vmatmul.msk.bf16.vlgmr.msra.gmra.mxu3 %vm959_vm3, %v952_v52 }
 0x1bc   : > { %1621 = vmatmul.msk.bf16.vlgmr.msrb.gmra.mxu0 %vm959_vm3, %v953_v54 }
 0x1be   : > { %1622 = vmatmul.msk.bf16.vlgmr.msrb.gmra.mxu1 %vm959_vm3, %v954_v55 }
 0x1f3   : > { %v1763_v49 = vpop.permute.xlu1 %1762 }
 0x1f4   : > { %v1765_v56 = vunpack.i.h.bf16 %v1763_v49  ;;  %v1764_v57 = vunpack.i.l.bf16 %v1763_v49 }
 0x1f6   : > { %v616_v59 = vrot.slane %v1765_v56, 4  ;;  %v604_v60 = vrot.slane %v1764_v57, 4 }
 0x203   : > { %v1758_v58 = vpop.permute.xlu0 %1757 }
 0x204   : > { %v1760_v47 = vunpack.i.h.bf16 %v1758_v58  ;;  %v1759_v61 = vunpack.i.l.bf16 %v1758_v58 }
 0x206   : > { %v618_v62 = vrot.slane %v1760_v47, 4  ;;  %v605_v63 = vsel %vm528_vm1, %v604_v60, %v1759_v61  ;;  %v606_v0 = vrot.slane %v1759_v61, 4  ;;  %v617_v1 = vsel %vm528_vm1, %v616_v59, %v1760_v47 }
 0x207   : > { %v611_v2 = vperm.slane %v605_v63, %v2090_v27  ;;  %v623_v4 = vperm.slane %v617_v1, %v2090_v27 }
 0x208   : > { %v607_v5 = vsel %vm528_vm1, %v1764_v57, %v606_v0  ;;  %v619_v6 = vsel %vm528_vm1, %v1765_v56, %v618_v62 }
 0x209   : > { %v615_v7 = vperm.slane %v607_v5, %v2090_v27  ;;  %v627_v8 = vperm.slane %v619_v6, %v2090_v27  ;;  %v628_v9 = vrot.slane %v623_v4, 4  ;;  %v630_v10 = vrot.slane %v611_v2, 4 }
 0x20b   : > { %v629_v11 = vsel %vm528_vm1, %v628_v9, %v611_v2  ;;  %v631_v13 = vsel %vm528_vm1, %v623_v4, %v630_v10  ;;  %v640_v14 = vrot.slane %v627_v8, 4  ;;  %v642_v15 = vrot.slane %v615_v7, 4 }
 0x20c   : > { %v635_v16 = vperm.slane %v629_v11, %v2097_v38  ;;  %v639_v17 = vperm.slane %v631_v13, %v2097_v38 }
 0x20d   : > { %v641_v18 = vsel %vm528_vm1, %v640_v14, %v615_v7  ;;  %v643_v19 = vsel %vm528_vm1, %v627_v8, %v642_v15 }
 0x20e   : > { %v647_v20 = vperm.slane %v641_v18, %v2097_v38  ;;  %v651_v21 = vperm.slane %v643_v19, %v2097_v38  ;;  %v652_v22 = vrot.slane %v635_v16, 4  ;;  %v654_v23 = vrot.slane %v639_v17, 4 }
 0x20f   : > { %v660_v32 = vpack.c.bf16 %v635_v16, %v635_v16  ;;  %v662_v33 = vpack.c.bf16 %v639_v17, %v639_v17 }
 0x210   : > { %v656_v24 = vrot.slane %v647_v20, 4  ;;  %v658_v25 = vrot.slane %v651_v21, 4  ;;  %v653_v26 = vsel %vm528_vm1, 0.0, %v652_v22  ;;  %v655_v28 = vsel %vm528_vm1, 0.0, %v654_v23 }
 0x211   : > { %v664_v29 = vpack.c.bf16 %v647_v20, %v647_v20  ;;  %v666_v30 = vpack.c.bf16 %v651_v21, %v651_v21  ;;  %v661_v39 = vpack.c.bf16 %v653_v26, %v653_v26  ;;  %v663_v40 = vpack.c.bf16 %v655_v28, %v655_v28 }
 0x212   : > { %v657_v31 = vsel %vm528_vm1, 0.0, %v656_v24  ;;  %v659_v12 = vsel %vm528_vm1, 0.0, %v658_v25 }
 0x213   : > { %v665_v34 = vpack.c.bf16 %v657_v31, %v657_v31  ;;  %v667_v35 = vpack.c.bf16 %v659_v12, %v659_v12  ;;  %v730_v36 = vrot.slane %v664_v29, 4  ;;  %v736_v37 = vrot.slane %v666_v30, 4 }
 0x215   : > { %v731_v41 = vsel %vm528_vm1, %v730_v36, %v660_v32  ;;  %v737_v42 = vsel %vm528_vm1, %v736_v37, %v662_v33  ;;  %v750_v43 = vrot.slane %v665_v34, 4  ;;  %v756_v44 = vrot.slane %v667_v35, 4 }
 0x216   : > { %v741_v45 = vperm.slane %v737_v42, %v2090_v27  ;;  %v735_v50 = vperm.slane %v731_v41, %v2090_v27 }
 0x217   : > { %v751_v46 = vsel %vm528_vm1, %v750_v43, %v661_v39  ;;  %v757_v48 = vsel %vm528_vm1, %v756_v44, %v663_v40 }
 0x218   : > { %v742_v51 = vrot.slane %v741_v45, 4  ;;  %v761_v52 = vperm.slane %v757_v48, %v2090_v27  ;;  %v755_v54 = vperm.slane %v751_v46, %v2090_v27 }
 0x21a   : > { %v743_v53 = vsel %vm528_vm1, %v742_v51, %v735_v50  ;;  %v762_v55 = vrot.slane %v761_v52, 4 }
 0x21b   : > { %v747_v49 = vperm.slane %v743_v53, %v2097_v38 }
 0x21c   : > { %v763_v56 = vsel %vm528_vm1, %v762_v55, %v755_v54 }
 0x21d   : > { %v748_v57 = vrot.slane %v747_v49, 4  ;;  %v767_v58 = vperm.slane %v763_v56, %v2097_v38  ;;  %v774_v59 = vshrl.u32 %v747_v49, 16 }
 0x21f   : > { %v749_v60 = vsel %vm528_vm1, 0, %v748_v57  ;;  %v768_v47 = vrot.slane %v767_v58, 4  ;;  %v772_v61 = vpack.i.b16 %v767_v58, %v747_v49  ;;  %v775_v62 = vshrl.u32 %v767_v58, 16 }
 0x220   : > { %v782_v2 = vshrl.u32 %v749_v60, 16 }
 0x221   : > { %v769_v63 = vsel %vm528_vm1, 0, %v768_v47  ;;  %v776_v0 = vpack.i.b16 %v775_v62, %v774_v59  ;;  %786 = vst.msk [vmem:[#allocation3] sm:$0xf] %vm725_vm2, %v772_v61 }
 0x222   : > { %v780_v1 = vpack.i.b16 %v769_v63, %v749_v60  ;;  %v783_v4 = vshrl.u32 %v769_v63, 16 }
 0x223   : > { %787 = vst.msk [vmem:[#allocation3 + $0x4] sm:$0xf] %vm725_vm2, %v776_v0 }
 0x224   : > { %v784_v5 = vpack.i.b16 %v783_v4, %v782_v2  ;;  %788 = vst.msk [vmem:[#allocation3 + $0x8] sm:$0xf] %vm725_vm2, %v780_v1 }
 0x226   : > { %789 = vst.msk [vmem:[#allocation3 + $0xc] sm:$0xf] %vm725_vm2, %v784_v5 }
 0x228   : > { %v1076_v6 = vld [vmem:[#allocation3] sm:$0xf] }
 0x229   : > { %v1085_v7 = vsel %vm1083_vm4, %v1076_v6, 0 }
 0x22a   : > { %1094 = vmatpush.bf16.msrb.mxu2 %v1085_v7  ;;  %v1077_v8 = vld [vmem:[#allocation3 + $0x4] sm:$0xf] }
 0x22b   : > { %v1104_v9 = vsel %vm1083_vm4, %v1077_v8, 0  ;;  %v1078_v10 = vld [vmem:[#allocation3 + $0x8] sm:$0xf] }
 0x22c   : > { %1113 = vmatpush.bf16.msrb.mxu3 %v1104_v9  ;;  %v1123_v11 = vsel %vm1083_vm4, %v1078_v10, 0 }
 0x22d   : > { %1132 = vmatpush.bf16.msra.mxu0 %v1123_v11  ;;  %v1079_v13 = vld [vmem:[#allocation3 + $0xc] sm:$0xf] }
 0x22e   : > { %v1142_v14 = vsel %vm1083_vm4, %v1079_v13, 0 }
 0x22f   : > { %1151 = vmatpush.bf16.msra.mxu1 %v1142_v14 }
 0x239   : > { %v1013_v15 = vpop.f32.mrf.mxu0 }
 0x23a   : > { %v1042_v16 = vsel %vm959_vm3, %v1013_v15, -inf }
 0x23b   : > { %v1032_v17 = vpop.f32.mrf.mxu1  ;;  %1043 = vmax.xlane.f32.xlu1 %v1042_v16 }
 0x23c   : > { %v975_v18 = vpop.f32.mrf.mxu2  ;;  %v1045_v25 = vsel %vm959_vm3, %v1032_v17, -inf }
 0x23d   : > { %v1036_v19 = vsel %vm959_vm3, %v975_v18, -inf }
 0x23e   : > { %v994_v20 = vpop.f32.mrf.mxu3  ;;  %1037 = vmax.xlane.f32.xlu2 %v1036_v19 }
 0x23f   : > { %v1039_v21 = vsel %vm959_vm3, %v994_v20, -inf }
 0x240   : > { %1040 = vmax.xlane.f32.xlu0 %v1039_v21 }
 0x241   : > { %v1015_v22 = vpop.f32.mrf.mxu0 }
 0x243   : > { %v1034_v23 = vpop.f32.mrf.mxu1 }
 0x244   : > { %v977_v24 = vpop.f32.mrf.mxu2 }
 0x246   : > { %v996_v26 = vpop.f32.mrf.mxu3  ;;  %1046 = vmax.xlane.f32.xlu2 %v1045_v25 }
 0x2ae   : > { %v1044_v28 = vpop.xlane.xlu1 %1043 }
 0x2af   : > { %v1050_v29 = vsub.f32 %v1013_v15, %v1044_v28 }
 0x2b1   : > { %v1056_v30 = vmul.f32 1.442695, %v1050_v29  ;;  %v1038_v31 = vpop.xlane.xlu2 %1037 }
 0x2b2   : > { %v1048_v12 = vsub.f32 %v975_v18, %v1038_v31 }
 0x2b3   : > { %1775 = vpow2.f32 %v1056_v30  ;;  %v1041_v32 = vpop.xlane.xlu0 %1040 }
 0x2b4   : > { %v1052_v33 = vmul.f32 1.442695, %v1048_v12  ;;  %v1049_v34 = vsub.f32 %v994_v20, %v1041_v32 }
 0x2b6   : > { %1777 = vpow2.f32 %v1052_v33  ;;  %v1054_v35 = vmul.f32 1.442695, %v1049_v34 }
 0x2b8   : > { %1779 = vpow2.f32 %v1054_v35 }
 0x2b9   : > { %v1776_v36 = vpop.eup %1775  ;;  %v1047_v37 = vpop.xlane.xlu2 %1046 }
 0x2ba   : > { %v1074_v39 = vpack.c.bf16 %v1776_v36, %v1776_v36  ;;  %v1051_v40 = vsub.f32 %v1032_v17, %v1047_v37  ;;  %v1066_v41 = vsel %vm959_vm3, %v1776_v36, 0.0 }
 0x2bb   : > { %1067 = vadd.xlane.f32.xlu2 %v1066_v41 }
 0x2bc   : > { %v1778_v42 = vpop.eup %1777  ;;  %v1058_v43 = vmul.f32 1.442695, %v1051_v40  ;;  %1625 = vmatmul.msk.bf16.vlgmr.msra.gmra.mxu0 %vm959_vm3, %v1074_v39 }
 0x2bd   : > { %v1060_v44 = vsel %vm959_vm3, %v1778_v42, 0.0  ;;  %v1072_v45 = vpack.c.bf16 %v1778_v42, %v1778_v42 }
 0x2be   : > { %v1780_v46 = vpop.eup %1779  ;;  %1781 = vpow2.f32 %v1058_v43  ;;  %1061 = vadd.xlane.f32.xlu0 %v1060_v44 }
 0x2bf   : > { %1623 = vmatmul.msk.bf16.vlgmr.msrb.gmra.mxu2 %vm959_vm3, %v1072_v45  ;;  %v1073_v48 = vpack.c.bf16 %v1780_v46, %v1780_v46  ;;  %v1063_v50 = vsel %vm959_vm3, %v1780_v46, 0.0 }
 0x2c1   : > { %1624 = vmatmul.msk.bf16.vlgmr.msrb.gmra.mxu3 %vm959_vm3, %v1073_v48 }
 0x2c3   : > { %1064 = vadd.xlane.f32.xlu2 %v1063_v50 }
 0x2c4   : > { %v1782_v51 = vpop.eup %1781 }
 0x2c5   : > { %v1075_v52 = vpack.c.bf16 %v1782_v51, %v1782_v51  ;;  %v1069_v53 = vsel %vm959_vm3, %v1782_v51, 0.0 }
 0x2c6   : > { %1070 = vadd.xlane.f32.xlu1 %v1069_v53 }
 0x2c7   : > { %1626 = vmatmul.msk.bf16.vlgmr.msra.gmra.mxu1 %vm959_vm3, %v1075_v52 }
 0x32e   : > { %v1068_v54 = vpop.xlane.xlu2 %1067 }
 0x32f   : > { %1783 = vrcp.f32 %v1068_v54 }
 0x331   : > { %v1062_v55 = vpop.xlane.xlu0 %1061 }
 0x332   : > { %1785 = vrcp.f32 %v1062_v55 }
 0x335   : > { %v1784_v58 = vpop.eup %1783 }
 0x336   : > { %v1065_v56 = vpop.xlane.xlu2 %1064 }
 0x337   : > { %1787 = vrcp.f32 %v1065_v56 }
 0x338   : > { %v1786_v47 = vpop.eup %1785 }
 0x339   : > { %v1134_v49 = vpop.f32.mrf.mxu0  ;;  %v1071_v57 = vpop.xlane.xlu1 %1070 }
 0x33a   : > { %1789 = vrcp.f32 %v1071_v57  ;;  %v1163_v59 = vmul.f32 %v1784_v58, %v1134_v49 }
 0x33c   : > { %v1165_v63 = vrot.slane %v1163_v59, 4 }
 0x33d   : > { %v1788_v62 = vpop.eup %1787 }
 0x340   : > { %v1790_v1 = vpop.eup %1789 }
 0x341   : > { %v1136_v60 = vpop.f32.mrf.mxu0 }
 0x342   : > { %v1096_v61 = vpop.f32.mrf.mxu2 }
 0x343   : > { %v1161_v0 = vmul.f32 %v1786_v47, %v1096_v61 }
 0x344   : > { %v1115_v2 = vpop.f32.mrf.mxu3  ;;  %v1153_v4 = vpop.f32.mrf.mxu1 }
 0x345   : > { %v1166_v5 = vsel %vm528_vm1, %v1165_v63, %v1161_v0  ;;  %v1167_v6 = vrot.slane %v1161_v0, 4  ;;  %v1162_v7 = vmul.f32 %v1788_v62, %v1115_v2  ;;  %v1164_v8 = vmul.f32 %v1790_v1, %v1153_v4 }
 0x346   : > { %v1172_v9 = vperm.slane %v1166_v5, %v2090_v27 }
 0x347   : > { %v1168_v10 = vsel %vm528_vm1, %v1163_v59, %v1167_v6  ;;  %v1179_v11 = vrot.slane %v1162_v7, 4  ;;  %v1177_v13 = vrot.slane %v1164_v8, 4 }
 0x348   : > { %v1176_v14 = vperm.slane %v1168_v10, %v2090_v27  ;;  %v1191_v17 = vrot.slane %v1172_v9, 4 }
 0x349   : > { %v1178_v15 = vsel %vm528_vm1, %v1177_v13, %v1162_v7  ;;  %v1180_v16 = vsel %vm528_vm1, %v1164_v8, %v1179_v11 }
 0x34a   : > { %v1203_v18 = vrot.slane %v1176_v14, 4  ;;  %v1184_v19 = vperm.slane %v1178_v15, %v2090_v27  ;;  %v1188_v20 = vperm.slane %v1180_v16, %v2090_v27  ;;  %v1098_v21 = vpop.f32.mrf.mxu2 }
 0x34c   : > { %v1189_v22 = vrot.slane %v1184_v19, 4  ;;  %v1192_v23 = vsel %vm528_vm1, %v1184_v19, %v1191_v17  ;;  %v1201_v24 = vrot.slane %v1188_v20, 4  ;;  %v1204_v25 = vsel %vm528_vm1, %v1188_v20, %v1203_v18  ;;  %v1117_v26 = vpop.f32.mrf.mxu3  ;;  %v1155_v28 = vpop.f32.mrf.mxu1  ;;  %v1768_v18 = vld [vmem:[%s2366_s4] ss:$0 sm:$0xff] }
 0x34d   : > { %v1200_v29 = vperm.slane %v1192_v23, %v2097_v38  ;;  %v1212_v30 = vperm.slane %v1204_v25, %v2097_v38 }
 0x34e   : > { %v1190_v31 = vsel %vm528_vm1, %v1189_v22, %v1172_v9  ;;  %v1202_v12 = vsel %vm528_vm1, %v1201_v24, %v1176_v14  ;;  %v1670_v9 = vld [vmem:[%s2365_s3] sm:$0xff]  ;;  %v1923_v24 = vmov 32.0  }
 0x34f   : > { %v1196_v32 = vperm.slane %v1190_v31, %v2097_v38  ;;  %v1208_v33 = vperm.slane %v1202_v12, %v2097_v38  ;;  %v1215_v34 = vrot.slane %v1200_v29, 4  ;;  %v1219_v35 = vrot.slane %v1212_v30, 4 }
 0x350   : > { %1791 = vrcp.f32 %v1923_v24 }
 0x351   : > { %v1213_v36 = vrot.slane %v1196_v32, 4  ;;  %v1216_v37 = vsel %vm528_vm1, 0.0, %v1215_v34  ;;  %v1217_v39 = vrot.slane %v1208_v33, 4  ;;  %v1220_v40 = vsel %vm528_vm1, 0.0, %v1219_v35 }
 0x352   : > { %v1226_v41 = vrot.slane %v1216_v37, 4  ;;  %v1237_v42 = vrot.slane %v1220_v40, 4  ;;  %v1221_v43 = vsel %vm528_vm1, %v1215_v34, %v1196_v32  ;;  %v1232_v44 = vsel %vm528_vm1, %v1219_v35, %v1208_v33  ;;  %v1677_v37 = vld [vmem:[%s2369_s7 + $0x18] sm:$0xff] }
 0x353   : > { %v1214_v45 = vsel %vm528_vm1, 0.0, %v1213_v36  ;;  %v1218_v46 = vsel %vm528_vm1, 0.0, %v1217_v39  ;;  %v1225_v48 = vperm.slane %v1221_v43, %v2090_v27  ;;  %v1236_v50 = vperm.slane %v1232_v44, %v2090_v27  ;;  %v1672_v36 = vld [vmem:[#allocation4] sm:$0xff]  ;;  %1452 = vmatpush.bf16.msrb.mxu0 %v1677_v37  ;;  %v1675_v43 = vld [vmem:[%s2369_s7 + $0x8] sm:$0xff] }
 0x354   : > { %v1227_v51 = vsel %vm528_vm1, %v1226_v41, %v1214_v45  ;;  %v1238_v52 = vsel %vm528_vm1, %v1237_v42, %v1218_v46  ;;  %v1676_v41 = vld [vmem:[%s2369_s7 + $0x10] sm:$0xff] }
 0x355   : > { %v1231_v53 = vperm.slane %v1227_v51, %v2090_v27  ;;  %v1242_v54 = vperm.slane %v1238_v52, %v2090_v27  ;;  %v1245_v55 = vrot.slane %v1225_v48, 4  ;;  %v1257_v49 = vrot.slane %v1236_v50, 4  ;;  %v1769_v52 = vld [vmem:[%s2371_s9] ss:$0 sm:$0xff] }
 0x356   : > { %v1792_v25 = vpop.eup %1791 }
 0x357   : > { %v1246_v56 = vsel %vm528_vm1, %v1231_v53, %v1245_v55  ;;  %v1258_v57 = vsel %vm528_vm1, %v1242_v54, %v1257_v49  ;;  %v1243_v58 = vrot.slane %v1231_v53, 4  ;;  %v1255_v59 = vrot.slane %v1242_v54, 4  ;;  %1453 = vmatpush.bf16.msrb.mxu0 %v1676_v41  ;;  %v1770_v54 = vld [vmem:[%s2372_s10] ss:$0 sm:$0xff] }
 0x358   : > { %v1254_v60 = vperm.slane %v1246_v56, %v2097_v38  ;;  %v1266_v47 = vperm.slane %v1258_v57, %v2097_v38  ;;  %v1334_v26 = vmul.f32 32.0, %v1792_v25  ;;  %vm1338_vm7 = vweird.f32 %v1792_v25 }
 0x359   : > { %v1244_v61 = vsel %vm528_vm1, %v1243_v58, %v1225_v48  ;;  %v1256_v62 = vsel %vm528_vm1, %v1255_v59, %v1236_v50  ;;  %v1674_v58 = vld [vmem:[%s2369_s7] sm:$0xff] }
 0x35a   : > { %v1273_v63 = vrot.slane %v1254_v60, 4  ;;  %v1271_v0 = vrot.slane %v1266_v47, 4  ;;  %v1250_v27 = vperm.slane %v1244_v61, %v2097_v38  ;;  %v1262_v1 = vperm.slane %v1256_v62, %v2097_v38  ;;  %v1671_v38 = vld [vmem:[%s2365_s3 + $0x8] sm:$0xff]  ;;  %v1771_v59 = vld [vmem:[%s2368_s6] ss:$0 sm:$0xff] }
 0x35b   : > { %1322 = vmatpush.bf16.msra.mxu2 %v1671_v38  ;;  %v1335_v28 = vsub.f32 1.0, %v1334_v26  ;;  %1454 = vmatpush.bf16.msrb.mxu0 %v1675_v43 }
 0x35c   : > { %v1274_v2 = vsel %vm528_vm1, %v1266_v47, %v1273_v63  ;;  %v1272_v4 = vsel %vm528_vm1, %v1271_v0, %v1254_v60  ;;  %v1267_v5 = vrot.slane %v1262_v1, 4  ;;  %v1269_v6 = vrot.slane %v1250_v27, 4  ;;  %v1772_v0 = vld [vmem:[%s2370_s8] ss:$0 sm:$0xff] }
 0x35d   : > { %1284 = vrot.lane.b32.xlu2 %v1274_v2, %s1920_s25  ;;  %1280 = vrot.lane.b32.xlu1 %v1272_v4, %s1921_s16  ;;  %v1336_v29 = vmul.f32 %v1792_v25, %v1335_v28  ;;  %s1599_s25 = sshll.u32 %s460_s23, 3  ;;  %s1663_s16 = sshll.u32 %s1901_s28, 3 }
 0x35e   : > { %v1270_v7 = vsel %vm528_vm1, %v1262_v1, %v1269_v6  ;;  %v1268_v8 = vsel %vm528_vm1, %v1267_v5, %v1250_v27  ;;  %s1507_s27 = scalar_lea.hbm %s2375_s13, %s1663_s16  ;;  %s462_s14 = scalar_lea.vmem [#allocation7], %s1599_s25 }
 0x35f   : > { %1276 = vrot.lane.b32.xlu0 %v1270_v7, %s1922_s24  ;;  %1323 = vmatpush.bf16.msra.mxu2 %v1670_v9  ;;  %v1337_v30 = vadd.f32 %v1792_v25, %v1336_v29  ;;  %s1509_s28 = sshll.u32 %s462_s14, 4  ;;  %s1511_s17 = sshll.u32 %s1507_s27, 4  ;;  %s1510_s28 = int_to_ptr.vmem [resolvable:$true] %s1509_s28  ;;  %s1512_s17 = int_to_ptr.hbm [resolvable:$true] %s1511_s17 }
 0x360   : > { %1455 = vmatpush.bf16.msrb.mxu0 %v1674_v58  ;;  %s1841_s24 = sshra.s32 %s1512_s17, 4  ;;  %s1847_s25 = scalar_lea.hbm %s2375_s13, 16  ;;  %s1842_s24 = int_to_ptr.hbm [resolvable:$true] %s1841_s24 }
 0x361   : > { %v1339_v31 = vsel %vm1338_vm7, %v1792_v25, %v1337_v30  ;;  %s1843_s16 = scalar_lea.hbm %s1842_s24, 8  ;;  %p1848_p5 = scmp.lt.s32.totalorder %s1842_s24, %s2375_s13 }
 0x362   : > { %p1844_p1 = scmp.ne.s32.totalorder %s1842_s24, %s1843_s16  ;;  %p1849_p6 = scmp.lt.s32.totalorder %s1847_s25, %s1843_s16 }
 0x364   : > { %p1845_p2 = pnand %p1844_p1, %p2034_p4  ;;  %p1850_p7 = por %p1849_p6, %p1848_p5 }
 0x366   : > { %p1846_p3 = pneg %p1845_p2 }
 0x368   : > { %p1851_p9 = pnand %p1850_p7, %p1846_p3 }
 0x3b7   : > { %v1285_v14 = vpop.permute.xlu2 %1284 }
 0x3cf   : > { %v1281_v11 = vpop.permute.xlu1 %1280 }
 0x3d1   : > { %v1277_v10 = vpop.permute.xlu0 %1276 }
 0x3d2   : > { %v1287_v13 = vsel %vm959_vm3, %v1268_v8, %v1277_v10 }
 0x3d3   : > { %v1289_v15 = vsel %vm1288_vm5, %v1287_v13, %v1281_v11 }
 0x3d4   : > { %v1291_v16 = vsel %vm1290_vm6, %v1289_v15, %v1285_v14 }
 0x3d5   : > { %v1292_v17 = vpack.c.bf16 %v1291_v16, %v1291_v16 }
 0x3d7   : > { %1635 = vmatmul.msk.bf16.vlgmr.msra.gmra.mxu2 %vm500_vm0, %v1292_v17 }
 0x45a   : > { %v1325_v19 = vpop.f32.mrf.mxu2 }
 0x45b   : > { %v1326_v20 = vadd.f32 %v1768_v18, %v1325_v19 }
 0x45d   : > { %v1329_v21 = vadd.f32 %v1326_v20, %v2066_v3  ;;  %v1673_v3 = vld [vmem:[#allocation4 + $0x8] sm:$0xff]  ;;  %v1773_v20 = vld [vmem:[%s2373_s11] ss:$0 sm:$0xff] }
 0x45e   : > { %1399 = vmatpush.bf16.msra.mxu3 %v1673_v3 }
 0x45f   : > { %v1330_v22 = vsel %vm500_vm0, %v1329_v21, 0.0 }
 0x460   : > { %1331 = vadd.xlane.f32.xlu0 %v1330_v22 }
 0x462   : > { %v1327_v23 = vpop.f32.mrf.mxu2  ;;  %1400 = vmatpush.bf16.msra.mxu3 %v1672_v36 }
 0x463   : > { %v1774_v23 = vld [vmem:[%s2374_s12] ss:$0 sm:$0xff] }
 0x4d3   : > { %v1332_v12 = vpop.xlane.xlu0 %1331 }
 0x4d4   : > { %v1340_v32 = vmul.f32 %v1339_v31, %v1332_v12 }
 0x4d6   : > { %v1341_v33 = vsub.f32 %v1329_v21, %v1340_v32 }
 0x4d8   : > { %v1342_v34 = vmul.f32 %v1341_v33, %v1341_v33 }
 0x4da   : > { %v1343_v35 = vsel %vm500_vm0, %v1342_v34, 0.0 }
 0x4db   : > { %1344 = vadd.xlane.f32.xlu1 %v1343_v35 }
 0x54e   : > { %v1345_v39 = vpop.xlane.xlu1 %1344 }
 0x54f   : > { %v1346_v40 = vmul.f32 %v1345_v39, %v1339_v31 }
 0x551   : > { %v1347_v42 = vadd.f32 1e-05, %v1346_v40 }
 0x553   : > { %1793 = vrsqrt.f32 %v1347_v42  ;;  %vm1354_vm9 = vweird.f32 %v1347_v42 }
 0x559   : > { %v1794_v44 = vpop.eup %1793 }
 0x55a   : > { %v1349_v45 = vmul.f32 %v1794_v44, %v1347_v42  ;;  %vm1355_vm8 = vweird.f32 %v1794_v44 }
 0x55b   : > { %vm1356_vm10 = vmor %vm1354_vm9, %vm1355_vm8 }
 0x55c   : > { %v1350_v46 = vmul.f32 %v1794_v44, %v1349_v45 }
 0x55e   : > { %v1351_v48 = vmul.f32 0.5, %v1350_v46 }
 0x560   : > { %v1352_v50 = vsub.f32 1.5, %v1351_v48 }
 0x562   : > { %v1353_v51 = vmul.f32 %v1794_v44, %v1352_v50 }
 0x564   : > { %v1357_v53 = vsel %vm1356_vm10, %v1794_v44, %v1353_v51 }
 0x565   : > { %v1358_v55 = vmul.f32 %v1357_v53, %v1341_v33 }
 0x567   : > { %v1363_v49 = vmul.f32 %v1769_v52, %v1358_v55 }
 0x569   : > { %v1368_v56 = vadd.f32 %v1770_v54, %v1363_v49 }
 0x56b   : > { %v1369_v57 = vpack.c.bf16 %v1368_v56, %v1368_v56 }
 0x56d   : > { %1644 = vmatmul.msk.bf16.vlgmr.msra.gmra.mxu3 %vm500_vm0, %v1369_v57 }
 0x5f0   : > { %v1402_v60 = vpop.f32.mrf.mxu3 }
 0x5f1   : > { %v1403_v47 = vadd.f32 %v1771_v59, %v1402_v60 }
 0x5f3   : > { %v1406_v61 = vmax.f32 %v1403_v47, 0.0 }
 0x5f5   : > { %v1407_v62 = vpack.c.bf16 %v1406_v61, %v1406_v61 }
 0x5f7   : > { %1661 = vmatmul.msk.bf16.vlgmr.msrb.gmra.mxu0 %vm1444_vm11, %v1407_v62 }
 0x5f8   : > { %v1404_v63 = vpop.f32.mrf.mxu3 }
 0x674   : > { %v1457_v27 = vpop.f32.mrf.mxu0 }
 0x675   : > { %v1458_v1 = vadd.f32 %v1772_v0, %v1457_v27 }
 0x677   : > { %v1461_v2 = vadd.f32 %v1458_v1, %v1368_v56 }
 0x679   : > { %v1462_v4 = vsel %vm500_vm0, %v1461_v2, 0.0 }
 0x67a   : > { %1463 = vadd.xlane.f32.xlu2 %v1462_v4 }
 0x67c   : > { %v1459_v5 = vpop.f32.mrf.mxu0 }
 0x6ed   : > { %v1464_v6 = vpop.xlane.xlu2 %1463 }
 0x6ee   : > { %v1465_v7 = vmul.f32 %v1464_v6, %v1339_v31 }
 0x6f0   : > { %v1466_v8 = vsub.f32 %v1461_v2, %v1465_v7 }
 0x6f2   : > { %v1467_v38 = vmul.f32 %v1466_v8, %v1466_v8 }
 0x6f4   : > { %v1468_v9 = vsel %vm500_vm0, %v1467_v38, 0.0 }
 0x6f5   : > { %1469 = vadd.xlane.f32.xlu0 %v1468_v9 }
 0x768   : > { %v1470_v10 = vpop.xlane.xlu0 %1469 }
 0x769   : > { %v1471_v11 = vmul.f32 %v1470_v10, %v1339_v31 }
 0x76b   : > { %v1472_v13 = vadd.f32 1e-05, %v1471_v11 }
 0x76d   : > { %1795 = vrsqrt.f32 %v1472_v13  ;;  %vm1479_vm13 = vweird.f32 %v1472_v13 }
 0x773   : > { %v1796_v14 = vpop.eup %1795 }
 0x774   : > { %v1474_v15 = vmul.f32 %v1796_v14, %v1472_v13  ;;  %vm1480_vm12 = vweird.f32 %v1796_v14 }
 0x775   : > { %vm1481_vm14 = vmor %vm1479_vm13, %vm1480_vm12 }
 0x776   : > { %v1475_v16 = vmul.f32 %v1796_v14, %v1474_v15 }
 0x778   : > { %v1476_v17 = vmul.f32 0.5, %v1475_v16 }
 0x77a   : > { %v1477_v18 = vsub.f32 1.5, %v1476_v17 }
 0x77c   : > { %v1478_v19 = vmul.f32 %v1796_v14, %v1477_v18 }
 0x77e   : > { %v1482_v21 = vsel %vm1481_vm14, %v1796_v14, %v1478_v19 }
 0x77f   : > { %v1483_v22 = vmul.f32 %v1482_v21, %v1466_v8 }
 0x781   : > { %v1488_v24 = vmul.f32 %v1773_v20, %v1483_v22 }
 0x783   : > { %v1493_v25 = vadd.f32 %v1774_v23, %v1488_v24 }
 0x785   : > { %1494 = vst.msk [vmem:[%s462_s14] sm:$0xff] %vm500_vm0, %v1493_v25 }
 0x786   : > { %1854 = shalt.err (!%p1851_p9)
}
 0x787   : > { %1682 = dma.vmem_to_hbm [thread:$0]  (%p2034_p4), %s1510_s28, 128, %s1512_s17, %s1496_s22  }
 0x788 PF: > { %s2389_s23 = sld [smem:[#allocation10_spill]]  ;;  %p1694_p10 = scmp.ge.s32.totalorder %s1909_s30, 2 }
 0x78a   : > { %p1689_p11 = pnand %p1694_p10, %p2041_p8 }
 0x78c   : > { %p1690_p12 = pneg %p1689_p11 }
 0x78e   : > { %s1523_s21 = sand.u32 1, %s2389_s23  }
 0x78f   : > { %s1524_s19 = scalar_lea.sflag [#allocation6], %s1523_s21 }
 0x790   : > { %1884 = dma.done.wait (%p1690_p12), %s1524_s19, 128  }
 0x791   : > { %1886 = vsyncadd (%p1690_p12), %s1524_s19, 4294967168  ;;  %s27_s30 = sadd.s32 1, %s1909_s30   ;;  %s2390_s14 = sld [smem:[#allocation11_spill]] }
 0x792   : > { %p24_p13 = scmp.ge.s32.totalorder %s27_s30, 4   ;;  %s2391_s27 = sld [smem:[#allocation14_spill]] }
 0x793   : > { %s2392_s28 = sld [smem:[#allocation12_spill]]  ;;  %s2394_s25 = smov %s1893_s26 }
 0x794   : > { %s2393_s29 = sld [smem:[#allocation13_spill]]  ;;  %26 = sbr.rel (!%p24_p13) target bundleno = 7 (0x7), region = 116 }
 0x797   : > { %s2395_s26 = smov %s2390_s14 }
 0x799   :  { %1530 = vsyncpa [#allocation5], 1 }
 0x79a   :  { %1532 = vsyncpa [#allocation5 + $0x1], 1 }
 0x79b   :  { %1533 = vsyncpa [#allocation6], 1 }
 0x79c   :  { %1535 = vsyncpa [#allocation6 + $0x1], 1 }

</bundles_post_ra>
